<compile_context>
chip_gen: v6e
topology: v6e:2x2x1
jax: 0.10.0
libtpu: 0.0.40
codegen_flags: <defaults>
</compile_context>

<pallas_src>
import math

import jax
import jax.numpy as jnp
from jax import lax
from jax.experimental import pallas as pl
from jax.experimental.pallas import tpu as pltpu

ALPHA = 0.2      # LeakyReLU negative slope of the GAT layers
BN_EPS = 1e-5    # BatchNorm1d eps


# ----------------------------- kernel helpers (traced inside the kernel) -----

def _leaky_relu(x, alpha):
    return jnp.where(x >= 0, x, alpha * x)


def _elu(x):
    # F.elu with alpha=1; clamp the exp argument so the unselected branch is finite.
    return jnp.where(x > 0, x, jnp.exp(jnp.minimum(x, 0.0)) - 1.0)


def _softmax_axis1(e):
    # F.softmax(e, dim=1): softmax over the *first* node index i of e[b, i, j, ...]
    m = jnp.max(e, axis=1, keepdims=True)
    p = jnp.exp(e - m)
    s = jnp.sum(p, axis=1, keepdims=True)
    # EUP approximate reciprocal + one Newton step (error ~eps^2): keeps the
    # full-precision divide sequence off the VPU; denominator tensors are tiny.
    r = pl.reciprocal(s, approx=True)
    r = r * (2.0 - s * r)
    return p * r


# ----------------------------------- kernel ----------------------------------

def gat_pair_kernel(feats_ref, nbr_ref, w1_ref, mask_ref, w2_ref, a2o_ref,
                    wc1f_ref, wc1g_ref, bc1_ref, wc2t_ref, bc2_ref, prelu_ref,
                    out_ref):
    tb, N, F = nbr_ref.shape
    H, HD = mask_ref.shape            # H heads, HD = H * nhid (concat width)

    x = nbr_ref[...]                  # [tb, N, F]
    xf = x.reshape(tb * N, F)         # merge leading dims (layout-free)

    # ---- multi-head GraphAttentionLayer (concat=True), all heads fused ------
    # Single MXU call: columns [0:HD] = per-head Wh, [HD:HD+H] = Wh.a1,
    # [HD+H:HD+2H] = Wh.a2 (a-vectors folded into W wrapper-side).
    w1 = w1_ref[...]
    proj = jnp.dot(xf.astype(w1.dtype), w1, preferred_element_type=jnp.float32)
    Wh = proj[:, :HD]                                    # [tb*N, HD]
    f1 = proj[:, HD:HD + H].reshape(tb, N, H)            # f1[b,i,h] = Wh_h[b,i].a1_h
    f2 = proj[:, HD + H:HD + 2 * H].reshape(tb, N, H)    # f2[b,j,h] = Wh_h[b,j].a2_h

    e = _leaky_relu(f1[:, :, None, :] + f2[:, None, :, :], ALPHA)  # [tb,N(i),N(j),H]
    att = _softmax_axis1(e)                                        # softmax over i (dim=1)
    # Attention dropout is a no-op in eval mode (training=False).

    # Head-wise aggregation, loop-free:
    #   A[b,i,j,c] = att[b,i,j, c//nhid]  via a 0/1 one-hot mask matmul (MXU)
    #   hp[b,i,c]  = sum_j A[b,i,j,c] * Wh[b,j,c]   (== concat_h att_h @ Wh_h)
    # NOTE: moving the j-reduction onto the MXU needs a (j,h)->lane merged att
    # layout (unsupported reshape), so the broadcast-multiply-reduce is kept.
    A = jnp.dot(att.reshape(tb * N * N, H), mask_ref[...],
                preferred_element_type=jnp.float32).reshape(tb, N, N, HD)
    Wh3 = Wh.reshape(tb, N, HD)
    hp = jnp.sum(A * Wh3[:, None, :, :], axis=2)          # [tb, N, HD]
    x1 = _elu(hp)                                         # elu(concat of heads)

    # ---- output GraphAttentionLayer (concat=False), then F.elu --------------
    x1f = x1.reshape(tb * N, HD)
    nh = w2_ref.shape[1] - 1                              # nhid of output layer
    w2 = w2_ref[...]                                      # [HD, nhid+1]: (w_out | w_out@a1)
    proj2 = jnp.dot(x1f.astype(w2.dtype), w2, preferred_element_type=jnp.float32)
    Wh2 = proj2[:, :nh].reshape(tb, N, nh)                # [tb, N, nhid]
    g1 = proj2[:, nh:nh + 1].reshape(tb, N, 1)            # Wh2 . a[:nhid]  (folded)
    # TODO(synk): g2 keeps one cross-lane reduce over nhid lanes; folding it like
    # g1 would need a sublane->lane relayout that costs about the same at this size.
    g2 = jnp.sum(Wh2 * a2o_ref[...], axis=-1)             # [tb, N]  (Wh2 . a[nhid:])
    e2 = _leaky_relu(g1 + g2[:, None, :], ALPHA)          # [tb, N, N]
    att2 = _softmax_axis1(e2)
    hp2 = jnp.einsum('bij,bjd->bid', att2, Wh2,
                     preferred_element_type=jnp.float32)  # bmm(attention, Wh)
    x2 = _elu(hp2)                                        # forward_gat's F.elu
    gat = x2[:, 0, :]                                     # pooling == 'first' -> [tb, nhid]

    # ---- classifier head (cat([feats, gat]) eliminated via wc1 split) -------
    fe = feats_ref[...]                                   # [tb, nfeat]
    wc1f = wc1f_ref[...]
    wc1g = wc1g_ref[...]
    h1 = (jnp.dot(fe.astype(wc1f.dtype), wc1f, preferred_element_type=jnp.float32)
          + jnp.dot(gat.astype(wc1g.dtype), wc1g, preferred_element_type=jnp.float32)
          + bc1_ref[...])
    pw = prelu_ref[0, 0]                                  # PReLU scalar from SMEM
    h1 = jnp.where(h1 >= 0, h1, pw * h1)
    # BatchNorm1d (eval, running stats) is folded into wc2/bc2 wrapper-side.
    # Final linear computed transposed (trans_b matmul) so the stored slab is
    # [nclass, tb]: batch rows land on the lane axis -> lane-dense output store.
    wc2t = wc2t_ref[...]                                  # [nclass, nhid]
    out_t = lax.dot_general(wc2t, h1.astype(wc2t.dtype),
                            dimension_numbers=(((1,), (1,)), ((), ())),
                            preferred_element_type=jnp.float32)   # [nclass, tb]
    out_t = out_t + bc2_ref[...]                          # bc2 as [nclass, 1]
    out_ref[...] = out_t[None, :, :]                      # [1, nclass, tb]


# ---------------------------------- wrapper -----------------------------------

def gat_pair_classifier(feats, neighbor_feats, params, *,
                        compute_dtype=jnp.float32, batch_tile=None):
    """compute_dtype=jnp.bfloat16 targets the bf16 MXU on v6e/v7x at larger
    scales (matmuls still accumulate in f32; softmax/ELU/PReLU stay f32)."""
    B, nfeat = feats.shape
    _, N, Fn = neighbor_feats.shape
    H, F, D = params['w_heads'].shape
    HD = H * D
    nhid = params['w_out'].shape[1]
    nclass = params['wc2'].shape[1]

    # ---- batch tiling: fill the MXU M dim and amortize per-grid-step cost ----
    # tb*N ~ 256 rows (v6e/v7x 2x256^2 MXU; also >=128 for v5e).  For v7x one
    # may cap tb at ceil(B/2) so the grid stays >=2 and both TensorCores work.
    if batch_tile is None:
        tb = min(B, max(1, 256 // max(N, 1)))
    else:
        tb = batch_tile
    num_tiles = -(-B // tb)           # ceil-div: never drop trailing elements
    Bp = num_tiles * tb

    feats_in = feats.astype(compute_dtype)
    nbr_in = neighbor_feats.astype(compute_dtype)
    if Bp != B:                       # zero-pad the batch; padded rows are sliced off
        feats_in = jnp.pad(feats_in, ((0, Bp - B), (0, 0)))
        nbr_in = jnp.pad(nbr_in, ((0, Bp - B), (0, 0), (0, 0)))

    # ---- wrapper-side algebra (free XLA work) --------------------------------
    # Heads fused: W_all[:, h*D+d] = w_heads[h, :, d];  a-vectors folded into W.
    W_all = jnp.transpose(params['w_heads'], (1, 0, 2)).reshape(F, HD)
    Wa1 = jnp.einsum('hfd,hd->fh', params['w_heads'], params['a_heads'][:, :D])
    Wa2 = jnp.einsum('hfd,hd->fh', params['w_heads'], params['a_heads'][:, D:])
    w1_ext = jnp.concatenate([W_all, Wa1, Wa2], axis=1).astype(compute_dtype)
    head_mask = (jnp.arange(HD)[None, :] // D
                 == jnp.arange(H)[:, None]).astype(jnp.float32)       # [H, HD]

    wa1_out = params['w_out'] @ params['a_out'][:nhid]                # [HD]
    w2_ext = jnp.concatenate([params['w_out'], wa1_out[:, None]],
                             axis=1).astype(compute_dtype)            # [HD, nhid+1]
    a2_out = params['a_out'][None, nhid:]                             # [1, nhid]

    wc1_f = params['wc1'][:nfeat].astype(compute_dtype)               # feats half
    wc1_g = params['wc1'][nfeat:].astype(compute_dtype)               # gat half
    bc1 = params['bc1'][None, :]

    # Fold eval-mode BatchNorm1d into the final linear (pre-transposed).
    bn_scale = params['bn_gamma'] / jnp.sqrt(params['bn_running_var'] + BN_EPS)
    bn_shift = params['bn_beta'] - params['bn_running_mean'] * bn_scale
    wc2t_bn = (params['wc2'] * bn_scale[:, None]).T.astype(compute_dtype)  # [nclass, nhid]
    bc2_bn = (params['bc2'] + bn_shift @ params['wc2'])[:, None]           # [nclass, 1]

    prelu = params['prelu'].reshape(1, 1).astype(jnp.float32)

    def const_spec(a):
        nd = a.ndim
        return pl.BlockSpec(a.shape, lambda b, nd=nd: (0,) * nd)

    in_specs = [
        pl.BlockSpec((tb, nfeat), lambda b: (b, 0)),                  # feats
        pl.BlockSpec((tb, N, Fn), lambda b: (b, 0, 0)),               # neighbor feats
        const_spec(w1_ext),
        const_spec(head_mask),
        const_spec(w2_ext),
        const_spec(a2_out),
        const_spec(wc1_f),
        const_spec(wc1_g),
        const_spec(bc1),
        const_spec(wc2t_bn),
        const_spec(bc2_bn),
        pl.BlockSpec(memory_space=pltpu.MemorySpace.SMEM),            # PReLU scalar
    ]

    out3 = pl.pallas_call(
        gat_pair_kernel,
        out_shape=jax.ShapeDtypeStruct((num_tiles, nclass, tb), jnp.float32),
        grid=(num_tiles,),
        in_specs=in_specs,
        out_specs=pl.BlockSpec((1, nclass, tb), lambda b: (b, 0, 0)),
        compiler_params=pltpu.CompilerParams(
            dimension_semantics=("parallel",)),
    )(feats_in, nbr_in, w1_ext, head_mask, w2_ext, a2_out,
      wc1_f, wc1_g, bc1, wc2t_bn, bc2_bn, prelu)

    # [num_tiles, nclass, tb] -> [Bp, nclass]; module output is logits[:, 0] (.squeeze(1))
    out = jnp.transpose(out3, (0, 2, 1)).reshape(Bp, nclass)[:B, 0]
    return out


# ------------------------- pure-JAX reference (op-for-op, unfused) ------------

def reference(feats, nbr, params):
    nheads, _, nhid = params['w_heads'].shape
    x = nbr
    outs = []
    for h in range(nheads):
        W = params['w_heads'][h]
        a = params['a_heads'][h]
        Wh = jnp.einsum('bnf,fd->bnd', x, W)
        e = _leaky_relu(jnp.einsum('bnd,d->bn', Wh, a[:nhid])[:, :, None]
                        + jnp.einsum('bnd,d->bn', Wh, a[nhid:])[:, None, :], ALPHA)
        att = jax.nn.softmax(e, axis=1)
        outs.append(jax.nn.elu(jnp.einsum('bij,bjd->bid', att, Wh)))
    x1 = jnp.concatenate(outs, axis=-1)
    Wh2 = jnp.einsum('bnf,fd->bnd', x1, params['w_out'])
    a = params['a_out']
    e2 = _leaky_relu(jnp.einsum('bnd,d->bn', Wh2, a[:nhid])[:, :, None]
                     + jnp.einsum('bnd,d->bn', Wh2, a[nhid:])[:, None, :], ALPHA)
    att2 = jax.nn.softmax(e2, axis=1)
    x2 = jax.nn.elu(jnp.einsum('bij,bjd->bid', att2, Wh2))
    gat = x2[:, 0, :]
    cat = jnp.concatenate([feats, gat], axis=1)
    h1 = cat @ params['wc1'] + params['bc1']
    h1 = jnp.where(h1 >= 0, h1, params['prelu'][0, 0] * h1)
    h1 = ((h1 - params['bn_running_mean']) /
          jnp.sqrt(params['bn_running_var'] + BN_EPS)) * params['bn_gamma'] + params['bn_beta']
    return (h1 @ params['wc2'] + params['bc2'])[:, 0]


# ----------------------------------- main --------------------------------------

def init_params(key, nfeat, nhid, nclass, nheads):
    ks = jax.random.split(key, 8)

    def xavier(k, shape, gain=1.414):
        fan_in, fan_out = shape[-2], shape[-1]
        bound = gain * math.sqrt(6.0 / (fan_in + fan_out))
        return jax.random.uniform(k, shape, jnp.float32, -bound, bound)

    def linear_w(k, fan_in, fan_out):
        bound = 1.0 / math.sqrt(fan_in)
        return jax.random.uniform(k, (fan_in, fan_out), jnp.float32, -bound, bound)

    return dict(
        w_heads=xavier(ks[0], (nheads, nfeat, nhid)),
        a_heads=xavier(ks[1], (nheads, 2 * nhid, 1))[..., 0],      # [H, 2*nhid]
        w_out=xavier(ks[2], (nhid * nheads, nhid)),
        a_out=xavier(ks[3], (2 * nhid, 1))[:, 0],                  # [2*nhid]
        wc1=linear_w(ks[4], nfeat + nhid, nhid),
        bc1=jax.random.uniform(ks[5], (nhid,), jnp.float32,
                               -1.0 / math.sqrt(nfeat + nhid), 1.0 / math.sqrt(nfeat + nhid)),
        prelu=jnp.full((1, 1), 0.25, jnp.float32),
        bn_gamma=jnp.ones((nhid,), jnp.float32),
        bn_beta=jnp.zeros((nhid,), jnp.float32),
        bn_running_mean=jnp.zeros((nhid,), jnp.float32),
        bn_running_var=jnp.ones((nhid,), jnp.float32),
        wc2=linear_w(ks[6], nhid, nclass),
        bc2=jax.random.uniform(ks[7], (nclass,), jnp.float32,
                               -1.0 / math.sqrt(nhid), 1.0 / math.sqrt(nhid)),
    )


if __name__ == "__main__":
    B, N, nfeat, nhid, nheads, nclass = 2, 8, 32, 8, 8, 1
    key = jax.random.PRNGKey(0)
    k_feats, k_nbr, k_params = jax.random.split(key, 3)

    feats = jax.random.normal(k_feats, (B, nfeat), jnp.float32)
    neighbor_feats = jax.random.normal(k_nbr, (B, N, nfeat), jnp.float32)
    params = init_params(k_params, nfeat, nhid, nclass, nheads)

    out = jax.block_until_ready(gat_pair_classifier(feats, neighbor_feats, params))
    ref = reference(feats, neighbor_feats, params)
    assert out.shape == (B,)
    # Tolerance covers the Newton-refined EUP approximate reciprocal in softmax.
    assert jnp.allclose(out, ref, atol=5e-4, rtol=5e-4), (out, ref)
    print("KERNEL_OK")
</pallas_src>

<mosaic_0001>
module attributes {stable_mosaic.version = 11 : i64} {
  func.func @gat_pair_kernel(%arg0: i32, %arg1: memref<2x32xf32, #tpu.memory_space<vmem>>, %arg2: memref<2x8x32xf32, #tpu.memory_space<vmem>>, %arg3: memref<32x80xf32, #tpu.memory_space<vmem>>, %arg4: memref<8x64xf32, #tpu.memory_space<vmem>>, %arg5: memref<64x9xf32, #tpu.memory_space<vmem>>, %arg6: memref<1x8xf32, #tpu.memory_space<vmem>>, %arg7: memref<32x8xf32, #tpu.memory_space<vmem>>, %arg8: memref<8x8xf32, #tpu.memory_space<vmem>>, %arg9: memref<1x8xf32, #tpu.memory_space<vmem>>, %arg10: memref<1x8xf32, #tpu.memory_space<vmem>>, %arg11: memref<1x1xf32, #tpu.memory_space<vmem>>, %arg12: memref<1x1xf32, #tpu.memory_space<smem>>, %arg13: memref<1x1x2xf32, #tpu.memory_space<vmem>>) attributes {dimension_semantics = [#tpu.dimension_semantics<parallel>], iteration_bounds = array<i64: 1>, scalar_prefetch = 0 : i64, scratch_operands = 0 : i64, tpu.core_type = #tpu.core_type<tc>, window_params = [{transform_indices = @transform_0, window_bounds = array<i64: 2, 32>}, {transform_indices = @transform_1, window_bounds = array<i64: 2, 8, 32>}, {pipeline_mode = #tpu.pipeline_mode<synchronous>, transform_indices = @transform_2, window_bounds = array<i64: 32, 80>}, {pipeline_mode = #tpu.pipeline_mode<synchronous>, transform_indices = @transform_3, window_bounds = array<i64: 8, 64>}, {pipeline_mode = #tpu.pipeline_mode<synchronous>, transform_indices = @transform_4, window_bounds = array<i64: 64, 9>}, {pipeline_mode = #tpu.pipeline_mode<synchronous>, transform_indices = @transform_5, window_bounds = array<i64: 1, 8>}, {pipeline_mode = #tpu.pipeline_mode<synchronous>, transform_indices = @transform_6, window_bounds = array<i64: 32, 8>}, {pipeline_mode = #tpu.pipeline_mode<synchronous>, transform_indices = @transform_7, window_bounds = array<i64: 8, 8>}, {pipeline_mode = #tpu.pipeline_mode<synchronous>, transform_indices = @transform_8, window_bounds = array<i64: 1, 8>}, {pipeline_mode = #tpu.pipeline_mode<synchronous>, transform_indices = @transform_9, window_bounds = array<i64: 1, 8>}, {pipeline_mode = #tpu.pipeline_mode<synchronous>, transform_indices = @transform_10, window_bounds = array<i64: 1, 1>}, {transform_indices = @transform_11, window_bounds = array<i64: 1, 1>}, {transform_indices = @transform_12, window_bounds = array<i64: 1, 1, 2>}]} {
    %c0 = arith.constant 0 : index
    %c0_0 = arith.constant 0 : index
    %c0_1 = arith.constant 0 : index
    %0 = vector.load %arg2[%c0, %c0_0, %c0_1] : memref<2x8x32xf32, #tpu.memory_space<vmem>>, vector<2x8x32xf32>
    %1 = vector.shape_cast %0 : vector<2x8x32xf32> to vector<16x32xf32>
    %c0_2 = arith.constant 0 : index
    %c0_3 = arith.constant 0 : index
    %2 = vector.load %arg3[%c0_2, %c0_3] : memref<32x80xf32, #tpu.memory_space<vmem>>, vector<32x80xf32>
    %cst = arith.constant dense<0.000000e+00> : vector<16x80xf32>
    %3 = tpu.matmul %1, %2, %cst {dimension_numbers = #tpu.dot_dimension_numbers<[1], [0], [0], [1], [0, 0, 1, 1], [], []>} : vector<16x32xf32>, vector<32x80xf32>, vector<16x80xf32> -> vector<16x80xf32>
    %4 = vector.extract_strided_slice %3 {offsets = [0, 0], sizes = [16, 64], strides = [1, 1]} : vector<16x80xf32> to vector<16x64xf32>
    %5 = vector.extract_strided_slice %3 {offsets = [0, 64], sizes = [16, 8], strides = [1, 1]} : vector<16x80xf32> to vector<16x8xf32>
    %6 = vector.shape_cast %5 : vector<16x8xf32> to vector<2x8x8xf32>
    %7 = vector.extract_strided_slice %3 {offsets = [0, 72], sizes = [16, 8], strides = [1, 1]} : vector<16x80xf32> to vector<16x8xf32>
    %8 = vector.shape_cast %7 : vector<16x8xf32> to vector<2x8x8xf32>
    %9 = vector.shape_cast %6 : vector<2x8x8xf32> to vector<2x8x1x8xf32>
    %10 = vector.shape_cast %8 : vector<2x8x8xf32> to vector<2x1x8x8xf32>
    %11 = vector.broadcast %9 : vector<2x8x1x8xf32> to vector<2x8x8x8xf32>
    %12 = vector.broadcast %10 : vector<2x1x8x8xf32> to vector<2x8x8x8xf32>
    %13 = arith.addf %11, %12 : vector<2x8x8x8xf32>
    %cst_4 = arith.constant 0.000000e+00 : f32
    %14 = vector.broadcast %cst_4 : f32 to vector<2x8x8x8xf32>
    %15 = arith.cmpf oge, %13, %14 : vector<2x8x8x8xf32>
    %cst_5 = arith.constant 2.000000e-01 : f32
    %16 = vector.broadcast %cst_5 : f32 to vector<2x8x8x8xf32>
    %17 = arith.mulf %16, %13 : vector<2x8x8x8xf32>
    %18 = arith.select %15, %13, %17 : vector<2x8x8x8xi1>, vector<2x8x8x8xf32>
    %cst_6 = arith.constant dense<0xFF800000> : vector<2x8x8xf32>
    %19 = vector.multi_reduction <maximumf>, %18, %cst_6 [1] : vector<2x8x8x8xf32> to vector<2x8x8xf32>
    %20 = vector.shape_cast %19 : vector<2x8x8xf32> to vector<2x1x8x8xf32>
    %21 = vector.broadcast %20 : vector<2x1x8x8xf32> to vector<2x8x8x8xf32>
    %22 = arith.subf %18, %21 : vector<2x8x8x8xf32>
    %23 = math.exp %22 : vector<2x8x8x8xf32>
    %cst_7 = arith.constant dense<0.000000e+00> : vector<2x8x8xf32>
    %24 = vector.multi_reduction <add>, %23, %cst_7 [1] : vector<2x8x8x8xf32> to vector<2x8x8xf32>
    %25 = vector.shape_cast %24 : vector<2x8x8xf32> to vector<2x1x8x8xf32>
    %26 = tpu.reciprocal %25 {approx = true} : vector<2x1x8x8xf32> -> vector<2x1x8x8xf32>
    %27 = arith.mulf %25, %26 : vector<2x1x8x8xf32>
    %cst_8 = arith.constant 2.000000e+00 : f32
    %28 = vector.broadcast %cst_8 : f32 to vector<2x1x8x8xf32>
    %29 = arith.subf %28, %27 : vector<2x1x8x8xf32>
    %30 = arith.mulf %26, %29 : vector<2x1x8x8xf32>
    %31 = vector.broadcast %30 : vector<2x1x8x8xf32> to vector<2x8x8x8xf32>
    %32 = arith.mulf %23, %31 : vector<2x8x8x8xf32>
    %33 = vector.shape_cast %32 : vector<2x8x8x8xf32> to vector<128x8xf32>
    %c0_9 = arith.constant 0 : index
    %c0_10 = arith.constant 0 : index
    %34 = vector.load %arg4[%c0_9, %c0_10] : memref<8x64xf32, #tpu.memory_space<vmem>>, vector<8x64xf32>
    %cst_11 = arith.constant dense<0.000000e+00> : vector<128x64xf32>
    %35 = tpu.matmul %33, %34, %cst_11 {dimension_numbers = #tpu.dot_dimension_numbers<[1], [0], [0], [1], [0, 0, 1, 1], [], []>} : vector<128x8xf32>, vector<8x64xf32>, vector<128x64xf32> -> vector<128x64xf32>
    %36 = vector.shape_cast %35 : vector<128x64xf32> to vector<2x8x8x64xf32>
    %37 = vector.shape_cast %4 : vector<16x64xf32> to vector<2x8x64xf32>
    %38 = vector.shape_cast %37 : vector<2x8x64xf32> to vector<2x1x8x64xf32>
    %39 = vector.broadcast %38 : vector<2x1x8x64xf32> to vector<2x8x8x64xf32>
    %40 = arith.mulf %36, %39 : vector<2x8x8x64xf32>
    %cst_12 = arith.constant dense<0.000000e+00> : vector<2x8x64xf32>
    %41 = vector.multi_reduction <add>, %40, %cst_12 [2] : vector<2x8x8x64xf32> to vector<2x8x64xf32>
    %cst_13 = arith.constant 0.000000e+00 : f32
    %42 = vector.broadcast %cst_13 : f32 to vector<2x8x64xf32>
    %43 = arith.cmpf ogt, %41, %42 : vector<2x8x64xf32>
    %cst_14 = arith.constant 0.000000e+00 : f32
    %44 = vector.broadcast %cst_14 : f32 to vector<2x8x64xf32>
    %45 = arith.minimumf %41, %44 : vector<2x8x64xf32>
    %46 = math.exp %45 : vector<2x8x64xf32>
    %cst_15 = arith.constant 1.000000e+00 : f32
    %47 = vector.broadcast %cst_15 : f32 to vector<2x8x64xf32>
    %48 = arith.subf %46, %47 : vector<2x8x64xf32>
    %49 = arith.select %43, %41, %48 : vector<2x8x64xi1>, vector<2x8x64xf32>
    %50 = vector.shape_cast %49 : vector<2x8x64xf32> to vector<16x64xf32>
    %c0_16 = arith.constant 0 : index
    %c0_17 = arith.constant 0 : index
    %51 = vector.load %arg5[%c0_16, %c0_17] : memref<64x9xf32, #tpu.memory_space<vmem>>, vector<64x9xf32>
    %cst_18 = arith.constant dense<0.000000e+00> : vector<16x9xf32>
    %52 = tpu.matmul %50, %51, %cst_18 {dimension_numbers = #tpu.dot_dimension_numbers<[1], [0], [0], [1], [0, 0, 1, 1], [], []>} : vector<16x64xf32>, vector<64x9xf32>, vector<16x9xf32> -> vector<16x9xf32>
    %53 = vector.extract_strided_slice %52 {offsets = [0, 0], sizes = [16, 8], strides = [1, 1]} : vector<16x9xf32> to vector<16x8xf32>
    %54 = vector.shape_cast %53 : vector<16x8xf32> to vector<2x8x8xf32>
    %55 = vector.extract_strided_slice %52 {offsets = [0, 8], sizes = [16, 1], strides = [1, 1]} : vector<16x9xf32> to vector<16x1xf32>
    %56 = vector.shape_cast %55 : vector<16x1xf32> to vector<2x8x1xf32>
    %c0_19 = arith.constant 0 : index
    %c0_20 = arith.constant 0 : index
    %57 = vector.load %arg6[%c0_19, %c0_20] : memref<1x8xf32, #tpu.memory_space<vmem>>, vector<1x8xf32>
    %58 = vector.shape_cast %57 : vector<1x8xf32> to vector<1x1x8xf32>
    %59 = vector.broadcast %58 : vector<1x1x8xf32> to vector<2x8x8xf32>
    %60 = arith.mulf %54, %59 : vector<2x8x8xf32>
    %cst_21 = arith.constant dense<0.000000e+00> : vector<2x8xf32>
    %61 = vector.multi_reduction <add>, %60, %cst_21 [2] : vector<2x8x8xf32> to vector<2x8xf32>
    %62 = vector.shape_cast %61 : vector<2x8xf32> to vector<2x1x8xf32>
    %63 = vector.broadcast %56 : vector<2x8x1xf32> to vector<2x8x8xf32>
    %64 = vector.broadcast %62 : vector<2x1x8xf32> to vector<2x8x8xf32>
    %65 = arith.addf %63, %64 : vector<2x8x8xf32>
    %cst_22 = arith.constant 0.000000e+00 : f32
    %66 = vector.broadcast %cst_22 : f32 to vector<2x8x8xf32>
    %67 = arith.cmpf oge, %65, %66 : vector<2x8x8xf32>
    %cst_23 = arith.constant 2.000000e-01 : f32
    %68 = vector.broadcast %cst_23 : f32 to vector<2x8x8xf32>
    %69 = arith.mulf %68, %65 : vector<2x8x8xf32>
    %70 = arith.select %67, %65, %69 : vector<2x8x8xi1>, vector<2x8x8xf32>
    %cst_24 = arith.constant dense<0xFF800000> : vector<2x8xf32>
    %71 = vector.multi_reduction <maximumf>, %70, %cst_24 [1] : vector<2x8x8xf32> to vector<2x8xf32>
    %72 = vector.shape_cast %71 : vector<2x8xf32> to vector<2x1x8xf32>
    %73 = vector.broadcast %72 : vector<2x1x8xf32> to vector<2x8x8xf32>
    %74 = arith.subf %70, %73 : vector<2x8x8xf32>
    %75 = math.exp %74 : vector<2x8x8xf32>
    %cst_25 = arith.constant dense<0.000000e+00> : vector<2x8xf32>
    %76 = vector.multi_reduction <add>, %75, %cst_25 [1] : vector<2x8x8xf32> to vector<2x8xf32>
    %77 = vector.shape_cast %76 : vector<2x8xf32> to vector<2x1x8xf32>
    %78 = tpu.reciprocal %77 {approx = true} : vector<2x1x8xf32> -> vector<2x1x8xf32>
    %79 = arith.mulf %77, %78 : vector<2x1x8xf32>
    %cst_26 = arith.constant 2.000000e+00 : f32
    %80 = vector.broadcast %cst_26 : f32 to vector<2x1x8xf32>
    %81 = arith.subf %80, %79 : vector<2x1x8xf32>
    %82 = arith.mulf %78, %81 : vector<2x1x8xf32>
    %83 = vector.broadcast %82 : vector<2x1x8xf32> to vector<2x8x8xf32>
    %84 = arith.mulf %75, %83 : vector<2x8x8xf32>
    "tpu.trace_start"() <{level = 10 : i32, message = "bij,bjd->bid"}> : () -> ()
    %cst_27 = arith.constant dense<0.000000e+00> : vector<2x8x8xf32>
    %85 = tpu.matmul %84, %54, %cst_27 {dimension_numbers = #tpu.dot_dimension_numbers<[2], [1], [1], [2], [0, 0, 0, 1, 1, 2], [0], [0]>} : vector<2x8x8xf32>, vector<2x8x8xf32>, vector<2x8x8xf32> -> vector<2x8x8xf32>
    %cst_28 = arith.constant 0.000000e+00 : f32
    "tpu.trace_stop"() : () -> ()
    %86 = vector.broadcast %cst_28 : f32 to vector<2x8x8xf32>
    %87 = arith.cmpf ogt, %85, %86 : vector<2x8x8xf32>
    %cst_29 = arith.constant 0.000000e+00 : f32
    %88 = vector.broadcast %cst_29 : f32 to vector<2x8x8xf32>
    %89 = arith.minimumf %85, %88 : vector<2x8x8xf32>
    %90 = math.exp %89 : vector<2x8x8xf32>
    %cst_30 = arith.constant 1.000000e+00 : f32
    %91 = vector.broadcast %cst_30 : f32 to vector<2x8x8xf32>
    %92 = arith.subf %90, %91 : vector<2x8x8xf32>
    %93 = arith.select %87, %85, %92 : vector<2x8x8xi1>, vector<2x8x8xf32>
    %94 = vector.extract_strided_slice %93 {offsets = [0, 0, 0], sizes = [2, 1, 8], strides = [1, 1, 1]} : vector<2x8x8xf32> to vector<2x1x8xf32>
    %95 = vector.shape_cast %94 : vector<2x1x8xf32> to vector<2x8xf32>
    %c0_31 = arith.constant 0 : index
    %c0_32 = arith.constant 0 : index
    %96 = vector.load %arg1[%c0_31, %c0_32] : memref<2x32xf32, #tpu.memory_space<vmem>>, vector<2x32xf32>
    %c0_33 = arith.constant 0 : index
    %c0_34 = arith.constant 0 : index
    %97 = vector.load %arg7[%c0_33, %c0_34] : memref<32x8xf32, #tpu.memory_space<vmem>>, vector<32x8xf32>
    %c0_35 = arith.constant 0 : index
    %c0_36 = arith.constant 0 : index
    %98 = vector.load %arg8[%c0_35, %c0_36] : memref<8x8xf32, #tpu.memory_space<vmem>>, vector<8x8xf32>
    %cst_37 = arith.constant dense<0.000000e+00> : vector<2x8xf32>
    %99 = tpu.matmul %96, %97, %cst_37 {dimension_numbers = #tpu.dot_dimension_numbers<[1], [0], [0], [1], [0, 0, 1, 1], [], []>} : vector<2x32xf32>, vector<32x8xf32>, vector<2x8xf32> -> vector<2x8xf32>
    %cst_38 = arith.constant dense<0.000000e+00> : vector<2x8xf32>
    %100 = tpu.matmul %95, %98, %cst_38 {dimension_numbers = #tpu.dot_dimension_numbers<[1], [0], [0], [1], [0, 0, 1, 1], [], []>} : vector<2x8xf32>, vector<8x8xf32>, vector<2x8xf32> -> vector<2x8xf32>
    %101 = arith.addf %99, %100 : vector<2x8xf32>
    %c0_39 = arith.constant 0 : index
    %c0_40 = arith.constant 0 : index
    %102 = vector.load %arg9[%c0_39, %c0_40] : memref<1x8xf32, #tpu.memory_space<vmem>>, vector<1x8xf32>
    %103 = vector.broadcast %102 : vector<1x8xf32> to vector<2x8xf32>
    %104 = arith.addf %101, %103 : vector<2x8xf32>
    %c0_41 = arith.constant 0 : index
    %c0_42 = arith.constant 0 : index
    %105 = memref.load %arg12[%c0_41, %c0_42] : memref<1x1xf32, #tpu.memory_space<smem>>
    %cst_43 = arith.constant 0.000000e+00 : f32
    %106 = vector.broadcast %cst_43 : f32 to vector<2x8xf32>
    %107 = arith.cmpf oge, %104, %106 : vector<2x8xf32>
    %108 = vector.broadcast %105 : f32 to vector<2x8xf32>
    %109 = arith.mulf %108, %104 : vector<2x8xf32>
    %110 = arith.select %107, %104, %109 : vector<2x8xi1>, vector<2x8xf32>
    %c0_44 = arith.constant 0 : index
    %c0_45 = arith.constant 0 : index
    %111 = vector.load %arg10[%c0_44, %c0_45] : memref<1x8xf32, #tpu.memory_space<vmem>>, vector<1x8xf32>
    %cst_46 = arith.constant dense<0.000000e+00> : vector<1x2xf32>
    %112 = tpu.matmul %111, %110, %cst_46 {dimension_numbers = #tpu.dot_dimension_numbers<[1], [1], [0], [0], [0, 0, 1, 0], [], []>} : vector<1x8xf32>, vector<2x8xf32>, vector<1x2xf32> -> vector<1x2xf32>
    %c0_47 = arith.constant 0 : index
    %c0_48 = arith.constant 0 : index
    %113 = vector.load %arg11[%c0_47, %c0_48] : memref<1x1xf32, #tpu.memory_space<vmem>>, vector<1x1xf32>
    %114 = vector.broadcast %113 : vector<1x1xf32> to vector<1x2xf32>
    %115 = arith.addf %112, %114 : vector<1x2xf32>
    %116 = vector.shape_cast %115 : vector<1x2xf32> to vector<1x1x2xf32>
    %c0_49 = arith.constant 0 : index
    %c0_50 = arith.constant 0 : index
    %c0_51 = arith.constant 0 : index
    %117 = vector.load %arg13[%c0_49, %c0_50, %c0_51] : memref<1x1x2xf32, #tpu.memory_space<vmem>>, vector<1x1x2xf32>
    tpu.vector_store %arg13[%c0_49, %c0_50, %c0_51], %116 {strides = array<i32>} : memref<1x1x2xf32, #tpu.memory_space<vmem>>, vector<1x1x2xf32>,
    return
  }
  func.func @transform_0(%arg0: i32) -> (i32, i32) {
    %c0_i32 = arith.constant 0 : i32
    %c0_i32_0 = arith.constant 0 : i32
    return %arg0, %c0_i32 : i32, i32
  }
  func.func @transform_1(%arg0: i32) -> (i32, i32, i32) {
    %c0_i32 = arith.constant 0 : i32
    %c0_i32_0 = arith.constant 0 : i32
    %c0_i32_1 = arith.constant 0 : i32
    return %arg0, %c0_i32, %c0_i32_0 : i32, i32, i32
  }
  func.func @transform_2(%arg0: i32) -> (i32, i32) {
    %c0_i32 = arith.constant 0 : i32
    %c0_i32_0 = arith.constant 0 : i32
    %c0_i32_1 = arith.constant 0 : i32
    return %c0_i32, %c0_i32_0 : i32, i32
  }
  func.func @transform_3(%arg0: i32) -> (i32, i32) {
    %c0_i32 = arith.constant 0 : i32
    %c0_i32_0 = arith.constant 0 : i32
    %c0_i32_1 = arith.constant 0 : i32
    return %c0_i32, %c0_i32_0 : i32, i32
  }
  func.func @transform_4(%arg0: i32) -> (i32, i32) {
    %c0_i32 = arith.constant 0 : i32
    %c0_i32_0 = arith.constant 0 : i32
    %c0_i32_1 = arith.constant 0 : i32
    return %c0_i32, %c0_i32_0 : i32, i32
  }
  func.func @transform_5(%arg0: i32) -> (i32, i32) {
    %c0_i32 = arith.constant 0 : i32
    %c0_i32_0 = arith.constant 0 : i32
    %c0_i32_1 = arith.constant 0 : i32
    return %c0_i32, %c0_i32_0 : i32, i32
  }
  func.func @transform_6(%arg0: i32) -> (i32, i32) {
    %c0_i32 = arith.constant 0 : i32
    %c0_i32_0 = arith.constant 0 : i32
    %c0_i32_1 = arith.constant 0 : i32
    return %c0_i32, %c0_i32_0 : i32, i32
  }
  func.func @transform_7(%arg0: i32) -> (i32, i32) {
    %c0_i32 = arith.constant 0 : i32
    %c0_i32_0 = arith.constant 0 : i32
    %c0_i32_1 = arith.constant 0 : i32
    return %c0_i32, %c0_i32_0 : i32, i32
  }
  func.func @transform_8(%arg0: i32) -> (i32, i32) {
    %c0_i32 = arith.constant 0 : i32
    %c0_i32_0 = arith.constant 0 : i32
    %c0_i32_1 = arith.constant 0 : i32
    return %c0_i32, %c0_i32_0 : i32, i32
  }
  func.func @transform_9(%arg0: i32) -> (i32, i32) {
    %c0_i32 = arith.constant 0 : i32
    %c0_i32_0 = arith.constant 0 : i32
    %c0_i32_1 = arith.constant 0 : i32
    return %c0_i32, %c0_i32_0 : i32, i32
  }
  func.func @transform_10(%arg0: i32) -> (i32, i32) {
    %c0_i32 = arith.constant 0 : i32
    %c0_i32_0 = arith.constant 0 : i32
    %c0_i32_1 = arith.constant 0 : i32
    return %c0_i32, %c0_i32_0 : i32, i32
  }
  func.func @transform_11(%arg0: i32) -> (i32, i32) {
    %c0_i32 = arith.constant 0 : i32
    %c0_i32_0 = arith.constant 0 : i32
    %c0_i32_1 = arith.constant 0 : i32
    return %c0_i32, %c0_i32_0 : i32, i32
  }
  func.func @transform_12(%arg0: i32) -> (i32, i32, i32) {
    %c0_i32 = arith.constant 0 : i32
    %c0_i32_0 = arith.constant 0 : i32
    %c0_i32_1 = arith.constant 0 : i32
    return %arg0, %c0_i32, %c0_i32_0 : i32, i32, i32
  }
}

</mosaic_0001>

<bundles_post_ra>
// kernel: tpu_custom_call.1
= control target key start
LH: loop header
LB: loop body
LE: loop exit
PB: predicated region body
PF: predicated region fallthrough
CT: control target
= control target key end

     0   :  { %s2411_s0 = inlined_call_operand.vmem [shape: f32[2,32], index: 0, kind: input, shape index: {}]   ;;  %s2412_s1 = inlined_call_operand.vmem [shape: f32[2,8,32], index: 1, kind: input, shape index: {}]   ;;  %s2413_s2 = inlined_call_operand.vmem [shape: f32[32,80], index: 2, kind: input, shape index: {}]   ;;  %s2414_s3 = inlined_call_operand.vmem [shape: f32[8,64], index: 3, kind: input, shape index: {}]   ;;  %s2415_s4 = inlined_call_operand.vmem [shape: f32[64,9], index: 4, kind: input, shape index: {}]   ;;  %s2416_s5 = inlined_call_operand.vmem [shape: f32[1,8], index: 5, kind: input, shape index: {}]   ;;  %s2417_s6 = inlined_call_operand.vmem [shape: f32[32,8], index: 6, kind: input, shape index: {}]   ;;  %s2418_s7 = inlined_call_operand.vmem [shape: f32[8,8], index: 7, kind: input, shape index: {}]   ;;  %s2419_s8 = inlined_call_operand.vmem [shape: f32[1,8], index: 8, kind: input, shape index: {}]   ;;  %s2420_s9 = inlined_call_operand.vmem [shape: f32[1,8], index: 9, kind: input, shape index: {}]   ;;  %s2421_s10 = inlined_call_operand.<no memory space> [shape: f32[1,1], index: 10, kind: input, shape index: {}]   ;;  %s2422_s11 = inlined_call_operand.<no memory space> [shape: f32[1,1], index: 11, kind: input, shape index: {}]   ;;  %s2423_s12 = inlined_call_operand.hbm [shape: f32[1,1,2], index: 12, kind: output, shape index: {}]  }
   0x1   :  { %v17_v0 = vstv %s2421_s10 }
   0x2   :  { %18 = vst [vmem:[#allocation2] sm:$0x1] %v17_v0 }
   0x3   :  { %v50_v1 = vld [vmem:[%s2413_s2 + $0x18] sm:$0xff]  ;;  %v49_v2 = vld [vmem:[%s2413_s2 + $0x10] sm:$0xff]  ;;  %vm51_vm0 = vcmask 261120   ;;  %v45_v3 = vld [vmem:[%s2412_s1] sm:$0xff] }
   0x4   :  { %1716 = vmatprep.subr.mxu0 %v50_v1  ;;  %v48_v4 = vld [vmem:[%s2413_s2 + $0x8] sm:$0xff]  ;;  %1724 = vmatprep.mubr.msk.f32.mxu0 %vm51_vm0, %v45_v3 }
   0x5   :  { %1717 = vmatpush3.msra.mxu0 %v50_v1 }
   0x6   :  { %20 = vsyncpa [#allocation5], 0  ;;  %1718 = vmatprep.subr.mxu0 %v49_v2  ;;  %v47_v5 = vld [vmem:[%s2413_s2] sm:$0xff]  ;;  %v46_v6 = vld [vmem:[%s2412_s1 + $0x8] sm:$0xff]  ;;  %s1917_s16 = smov 120   ;;  %v139_v11 = vlaneseq  ;;  %vm383_vm1 = vcmask 589312  }
   0x7   :  { %1719 = vmatpush3.msra.mxu0 %v49_v2  ;;  %v1918_v9 = vmov 1966171168   ;;  %s1919_s17 = smov 64  }
   0x8   :  { %1720 = vmatprep.subr.mxu0 %v48_v4  ;;  %v137_v10 = vunpack.c.l.s4 %v1918_v9  ;;  %v2020_v13 = vshrl.u32 %v139_v11, 7 }
   0x9   :  { %1721 = vmatpush3.msra.mxu0 %v48_v4 }
   0xa   :  { %1722 = vmatprep.subr.mxu0 %v47_v5  ;;  %v138_v12 = vunpack.c.0.s8 %v137_v10  ;;  %v2030_v29 = vsub.s32 0, %v2020_v13 }
   0xb   :  { %1723 = vmatpush3.msra.mxu0 %v47_v5 }
   0xc   :  { %1725 = vmatmul.mubr.msk.f32.vlgmr.msra.gmra.mxu0 %vm51_vm0, %v46_v6  ;;  %v141_v15 = vsub.s32 %v138_v12, %v2020_v13 }
  0xcc   :  { %v2013_v7 = vpop.f32.mrf.mxu0 }
  0xcd   :  { %v184_v18 = vcombine.high %v2013_v7, %v2013_v7  ;;  %v191_v20 = vrot.slane %v2013_v7, %v141_v15 }
  0xce   :  { %v2015_v8 = vpop.f32.mrf.mxu0 }
  0xcf   :  { %313 = vrot.lane.b32.xlu0 %v2015_v8, %s1917_s16  ;;  %v135_v14 = vcombine.high %v2015_v8, %v2015_v8  ;;  %v142_v16 = vrot.slane %v2015_v8, %v141_v15  ;;  %v198_v22 = vrot.slane %v184_v18, %v141_v15  ;;  %v199_v25 = vcombine.high %v191_v20, %v191_v20 }
  0xd0   :  { %v2032_v30 = vrot.slane %v191_v20, %v141_v15 }
  0xd1   :  { %v149_v17 = vrot.slane %v135_v14, %v141_v15  ;;  %v150_v19 = vcombine.high %v142_v16, %v142_v16  ;;  %v158_v23 = vrot.slane %v142_v16, %v141_v15  ;;  %v200_v27 = vcombine.high %v198_v22, %v198_v22 }
  0xd2   :  { %v2034_v31 = vrot.slane %v198_v22, %v141_v15  ;;  %v221_v34 = vrot.slane %v199_v25, %v141_v15  ;;  %v229_v39 = vcombine.high %v2032_v30, %v2032_v30  ;;  %v268_v41 = vrot.slane %v2032_v30, %v2030_v29 }
  0xd3   :  { %315 = vrot.lane.b32.xlu0 %v2013_v7, %s1917_s16  ;;  %v151_v21 = vcombine.high %v149_v17, %v149_v17  ;;  %v172_v24 = vrot.slane %v150_v19, %v141_v15  ;;  %v165_v28 = vrot.slane %v149_v17, %v141_v15  ;;  %v180_v32 = vcombine.high %v158_v23, %v158_v23 }
  0xd4   :  { %v228_v36 = vrot.slane %v200_v27, %v141_v15  ;;  %v236_v38 = vrot.slane %v158_v23, %v2030_v29  ;;  %v230_v40 = vcombine.high %v2034_v31, %v2034_v31  ;;  %v231_v45 = vcombine.high %v221_v34, %v221_v34 }
  0xd5   :  { %v179_v26 = vrot.slane %v151_v21, %v141_v15  ;;  %v182_v33 = vcombine.high %v172_v24, %v172_v24  ;;  %v181_v37 = vcombine.high %v165_v28, %v165_v28  ;;  %v240_v42 = vrot.slane %v172_v24, %v2030_v29 }
  0xd6   :  { %v244_v43 = vrot.slane %v180_v32, %v2030_v29  ;;  %v252_v47 = vrot.slane %v165_v28, %v2030_v29  ;;  %v232_v50 = vcombine.high %v228_v36, %v228_v36  ;;  %v272_v54 = vrot.slane %v221_v34, %v2030_v29 }
  0xd7   :  { %v183_v35 = vcombine.high %v179_v26, %v179_v26  ;;  %v248_v44 = vrot.slane %v182_v33, %v2030_v29  ;;  %v256_v48 = vrot.slane %v179_v26, %v2030_v29  ;;  %v260_v51 = vrot.slane %v181_v37, %v2030_v29 }
  0xd8   :  { %v276_v58 = vrot.slane %v229_v39, %v2030_v29  ;;  %v280_v60 = vrot.slane %v231_v45, %v2030_v29  ;;  %v284_v61 = vrot.slane %v2034_v31, %v2030_v29  ;;  %v288_v62 = vrot.slane %v228_v36, %v2030_v29 }
  0xd9   :  { %v264_v49 = vrot.slane %v183_v35, %v2030_v29  ;;  %v292_v0 = vrot.slane %v230_v40, %v2030_v29  ;;  %v296_v4 = vrot.slane %v232_v50, %v2030_v29 }
 0x141   :  { %v314_v46 = vpop.permute.xlu0 %313 }
 0x142   :  { %v320_v52 = vadd.f32 %v314_v46, %v240_v42  ;;  %v322_v53 = vadd.f32 %v314_v46, %v248_v44  ;;  %v319_v55 = vadd.f32 %v314_v46, %v236_v38  ;;  %v324_v56 = vadd.f32 %v314_v46, %v256_v48 }
 0x143   :  { %v326_v57 = vadd.f32 %v314_v46, %v264_v49  ;;  %v323_v59 = vadd.f32 %v314_v46, %v252_v47  ;;  %v325_v63 = vadd.f32 %v314_v46, %v260_v51  ;;  %v321_v1 = vadd.f32 %v314_v46, %v244_v43 }
 0x144   :  { %vm336_vm2 = vcmp.ge.f32.partialorder %v320_v52, 0.0  ;;  %vm338_vm3 = vcmp.ge.f32.partialorder %v322_v53, 0.0  ;;  %v352_v2 = vmul.f32 0.2, %v320_v52  ;;  %v354_v3 = vmul.f32 0.2, %v322_v53 }
 0x145   :  { %vm335_vm4 = vcmp.ge.f32.partialorder %v319_v55, 0.0  ;;  %vm340_vm5 = vcmp.ge.f32.partialorder %v324_v56, 0.0  ;;  %vm342_vm6 = vcmp.ge.f32.partialorder %v326_v57, 0.0  ;;  %v356_v5 = vmul.f32 0.2, %v324_v56  ;;  %v316_v6 = vpop.permute.xlu0 %315 }
 0x146   :  { %vm339_vm7 = vcmp.ge.f32.partialorder %v323_v59, 0.0  ;;  %v358_v9 = vmul.f32 0.2, %v326_v57  ;;  %v2058_v10 = vsel %vm336_vm2, %v320_v52, %v352_v2  ;;  %v2060_v12 = vsel %vm338_vm3, %v322_v53, %v354_v3 }
 0x147   :  { %vm341_vm8 = vcmp.ge.f32.partialorder %v325_v63, 0.0  ;;  %v355_v14 = vmul.f32 0.2, %v323_v59  ;;  %v357_v15 = vmul.f32 0.2, %v325_v63  ;;  %v385_v16 = vsel %vm383_vm1, %v2058_v10, -inf }
 0x148   :  { %v2064_v17 = vsel %vm340_vm5, %v324_v56, %v356_v5  ;;  %v2066_v18 = vsel %vm342_vm6, %v326_v57, %v358_v9  ;;  %v388_v19 = vsel %vm383_vm1, %v2060_v12, -inf  ;;  %v328_v20 = vadd.f32 %v316_v6, %v272_v54 }
 0x149   :  { %v351_v21 = vmul.f32 0.2, %v319_v55  ;;  %v389_v22 = vmax.f32 %v385_v16, %v388_v19  ;;  %v329_v23 = vadd.f32 %v316_v6, %v276_v58  ;;  %v330_v24 = vadd.f32 %v316_v6, %v280_v60 }
 0x14a   :  { %v353_v25 = vmul.f32 0.2, %v321_v1  ;;  %v327_v26 = vadd.f32 %v316_v6, %v268_v41  ;;  %v331_v27 = vadd.f32 %v316_v6, %v284_v61  ;;  %v332_v28 = vadd.f32 %v316_v6, %v288_v62 }
 0x14b   :  { %v2071_v30 = vsel %vm339_vm7, %v323_v59, %v355_v14  ;;  %v2074_v31 = vsel %vm341_vm8, %v325_v63, %v357_v15  ;;  %v392_v32 = vsel %vm383_vm1, %v2064_v17, -inf  ;;  %v396_v33 = vsel %vm383_vm1, %v2066_v18, -inf }
 0x14c   :  { %v333_v34 = vadd.f32 %v316_v6, %v292_v0  ;;  %v334_v35 = vadd.f32 %v316_v6, %v296_v4  ;;  %vm344_vm9 = vcmp.ge.f32.partialorder %v328_v20, 0.0  ;;  %vm346_vm10 = vcmp.ge.f32.partialorder %v330_v24, 0.0 }
 0x14d   :  { %v393_v36 = vmax.f32 %v389_v22, %v392_v32  ;;  %vm345_vm11 = vcmp.ge.f32.partialorder %v329_v23, 0.0  ;;  %v360_v37 = vmul.f32 0.2, %v328_v20  ;;  %v362_v38 = vmul.f32 0.2, %v330_v24 }
 0x14e   :  { %vm347_vm12 = vcmp.ge.f32.partialorder %v331_v27, 0.0  ;;  %vm348_vm13 = vcmp.ge.f32.partialorder %v332_v28, 0.0  ;;  %v361_v39 = vmul.f32 0.2, %v329_v23  ;;  %v364_v40 = vmul.f32 0.2, %v332_v28 }
 0x14f   :  { %v2080_v41 = vsel %vm344_vm9, %v328_v20, %v360_v37  ;;  %v2082_v42 = vsel %vm346_vm10, %v330_v24, %v362_v38  ;;  %vm337_vm14 = vcmp.ge.f32.partialorder %v321_v1, 0.0  ;;  %v367_v43 = vsel %vm335_vm4, %v319_v55, %v351_v21 }
 0x150   :  { %vm349_vm15 = vcmp.ge.f32.partialorder %v333_v34, 0.0  ;;  %v359_v44 = vmul.f32 0.2, %v327_v26  ;;  %v363_v45 = vmul.f32 0.2, %v331_v27  ;;  %v400_v46 = vsel %vm383_vm1, %v2080_v41, -inf }
 0x151   :  { %vm350_vm2 = vcmp.ge.f32.partialorder %v334_v35, 0.0  ;;  %v365_v47 = vmul.f32 0.2, %v333_v34  ;;  %v366_v48 = vmul.f32 0.2, %v334_v35  ;;  %v403_v49 = vsel %vm383_vm1, %v2082_v42, -inf }
 0x152   :  { %v2089_v50 = vsel %vm348_vm13, %v332_v28, %v364_v40  ;;  %v404_v51 = vmax.f32 %v400_v46, %v403_v49  ;;  %v369_v52 = vsel %vm337_vm14, %v321_v1, %v353_v25  ;;  %v384_v53 = vsel %vm383_vm1, %v367_v43, -inf }
 0x153   :  { %v397_v54 = vmax.f32 %v393_v36, %v396_v33  ;;  %v386_v55 = vsel %vm383_vm1, %v369_v52, -inf  ;;  %vm343_vm3 = vcmp.ge.f32.partialorder %v327_v26, 0.0  ;;  %v377_v56 = vsel %vm345_vm11, %v329_v23, %v361_v39 }
 0x154   :  { %v379_v57 = vsel %vm347_vm12, %v331_v27, %v363_v45  ;;  %v387_v58 = vmax.f32 %v384_v53, %v386_v55  ;;  %v375_v59 = vsel %vm343_vm3, %v327_v26, %v359_v44  ;;  %v401_v60 = vsel %vm383_vm1, %v377_v56, -inf }
 0x155   :  { %v381_v61 = vsel %vm349_vm15, %v333_v34, %v365_v47  ;;  %v407_v62 = vsel %vm383_vm1, %v2089_v50, -inf  ;;  %v390_v63 = vsel %vm383_vm1, %v2071_v30, -inf  ;;  %v399_v0 = vsel %vm383_vm1, %v375_v59, -inf }
 0x156   :  { %v2103_v1 = vsel %vm350_vm2, %v334_v35, %v366_v48  ;;  %v408_v2 = vmax.f32 %v404_v51, %v407_v62  ;;  %v391_v3 = vmax.f32 %v387_v58, %v390_v63  ;;  %v402_v4 = vmax.f32 %v399_v0, %v401_v60 }
 0x157   :  { %v394_v5 = vsel %vm383_vm1, %v2074_v31, -inf  ;;  %v405_v6 = vsel %vm383_vm1, %v379_v57, -inf  ;;  %v409_v15 = vsel %vm383_vm1, %v381_v61, -inf  ;;  %v411_v16 = vsel %vm383_vm1, %v2103_v1, -inf }
 0x158   :  { %v395_v9 = vmax.f32 %v391_v3, %v394_v5  ;;  %v406_v14 = vmax.f32 %v402_v4, %v405_v6  ;;  %v412_v19 = vmax.f32 %v408_v2, %v411_v16  ;;  %vm759_vm4 = vcmask 523264  }
 0x159   :  { %vm992_vm6 = vcmask 1041409   ;;  %vm994_vm9 = vcmask 1042434   ;;  %vm996_vm12 = vcmask 1043459   ;;  %vm998_vm13 = vcmask 1044484  }
 0x15a   :  { %v398_v20 = vmax.f32 %v395_v9, %v397_v54  ;;  %v410_v21 = vmax.f32 %v406_v14, %v409_v15  ;;  %vm1000_vm14 = vcmask 1045509   ;;  %vm1002_vm2 = vcmask 1046534  }
 0x15b   :  { %vm1004_vm3 = vcmask 1047559  }
 0x15c   :  { %v414_v22 = vsub.f32 %v367_v43, %v398_v20  ;;  %v415_v23 = vsub.f32 %v2058_v10, %v398_v20  ;;  %v416_v24 = vsub.f32 %v369_v52, %v398_v20  ;;  %v417_v25 = vsub.f32 %v2060_v12, %v398_v20 }
 0x15d   :  { %v418_v26 = vsub.f32 %v2071_v30, %v398_v20  ;;  %v419_v27 = vsub.f32 %v2064_v17, %v398_v20  ;;  %v420_v28 = vsub.f32 %v2074_v31, %v398_v20  ;;  %v413_v35 = vmax.f32 %v410_v21, %v412_v19 }
 0x15e   :  { %v430_v32 = vmul.f32 1.442695, %v414_v22  ;;  %v432_v33 = vmul.f32 1.442695, %v415_v23  ;;  %v434_v34 = vmul.f32 1.442695, %v416_v24  ;;  %v421_v36 = vsub.f32 %v2066_v18, %v398_v20 }
 0x15f   :  { %v436_v37 = vmul.f32 1.442695, %v417_v25  ;;  %v438_v38 = vmul.f32 1.442695, %v418_v26  ;;  %v422_v39 = vsub.f32 %v375_v59, %v413_v35  ;;  %v440_v10 = vmul.f32 1.442695, %v419_v27 }
 0x160   :  { %1815 = vpow2.f32 %v430_v32  ;;  %v423_v12 = vsub.f32 %v2080_v41, %v413_v35  ;;  %v442_v30 = vmul.f32 1.442695, %v420_v28  ;;  %v424_v40 = vsub.f32 %v377_v56, %v413_v35 }
 0x161   :  { %1817 = vpow2.f32 %v432_v33  ;;  %v444_v17 = vmul.f32 1.442695, %v421_v36  ;;  %v425_v31 = vsub.f32 %v2082_v42, %v413_v35  ;;  %v446_v43 = vmul.f32 1.442695, %v422_v39 }
 0x162   :  { %1819 = vpow2.f32 %v434_v34  ;;  %v426_v44 = vsub.f32 %v379_v57, %v413_v35  ;;  %v448_v18 = vmul.f32 1.442695, %v423_v12  ;;  %v450_v45 = vmul.f32 1.442695, %v424_v40 }
 0x163   :  { %1821 = vpow2.f32 %v436_v37  ;;  %v427_v46 = vsub.f32 %v2089_v50, %v413_v35  ;;  %v452_v47 = vmul.f32 1.442695, %v425_v31  ;;  %v428_v41 = vsub.f32 %v381_v61, %v413_v35  ;;  %v516_v31 = vld [vmem:[%s2414_s3] sm:$0xff] }
 0x164   :  { %1823 = vpow2.f32 %v438_v38  ;;  %v454_v48 = vmul.f32 1.442695, %v426_v44  ;;  %v429_v49 = vsub.f32 %v2103_v1, %v413_v35  ;;  %1727 = vmatprep.subr.mxu1 %v516_v31 }
 0x165   :  { %1825 = vpow2.f32 %v440_v10  ;;  %v456_v42 = vmul.f32 1.442695, %v427_v46  ;;  %v458_v52 = vmul.f32 1.442695, %v428_v41  ;;  %1728 = vmatpush3.msra.mxu1 %v516_v31 }
 0x166   :  { %1827 = vpow2.f32 %v442_v30  ;;  %v460_v56 = vmul.f32 1.442695, %v429_v49 }
 0x167   :  { %1829 = vpow2.f32 %v444_v17 }
 0x168   :  { %1831 = vpow2.f32 %v446_v43 }
 0x169   :  { %1833 = vpow2.f32 %v448_v18 }
 0x16a   :  { %1835 = vpow2.f32 %v450_v45 }
 0x16b   :  { %1837 = vpow2.f32 %v452_v47 }
 0x16c   :  { %1839 = vpow2.f32 %v454_v48 }
 0x16d   :  { %v1816_v51 = vpop.eup %1815  ;;  %1841 = vpow2.f32 %v456_v42 }
 0x16e   :  { %v2121_v53 = vpop.eup %1817  ;;  %v462_v54 = vsel %vm383_vm1, %v1816_v51, 0.0  ;;  %1843 = vpow2.f32 %v458_v52 }
 0x16f   :  { %v1820_v55 = vpop.eup %1819  ;;  %v463_v50 = vsel %vm383_vm1, %v2121_v53, 0.0  ;;  %1845 = vpow2.f32 %v460_v56 }
 0x170   :  { %v2126_v57 = vpop.eup %1821  ;;  %v464_v58 = vadd.f32 %v463_v50, %v462_v54  ;;  %v465_v60 = vsel %vm383_vm1, %v1820_v55, 0.0 }
 0x171   :  { %v1824_v59 = vpop.eup %1823  ;;  %v467_v0 = vsel %vm383_vm1, %v2126_v57, 0.0 }
 0x172   :  { %v2129_v61 = vpop.eup %1825  ;;  %v466_v62 = vadd.f32 %v465_v60, %v464_v58  ;;  %v469_v4 = vsel %vm383_vm1, %v1824_v59, 0.0 }
 0x173   :  { %v1828_v63 = vpop.eup %1827  ;;  %v471_v15 = vsel %vm383_vm1, %v2129_v61, 0.0 }
 0x174   :  { %v2133_v1 = vpop.eup %1829  ;;  %v468_v2 = vadd.f32 %v467_v0, %v466_v62  ;;  %v473_v22 = vsel %vm383_vm1, %v1828_v63, 0.0 }
 0x175   :  { %v1832_v3 = vpop.eup %1831  ;;  %v475_v27 = vsel %vm383_vm1, %v2133_v1, 0.0 }
 0x176   :  { %v2136_v5 = vpop.eup %1833  ;;  %v470_v6 = vadd.f32 %v469_v4, %v468_v2  ;;  %v477_v9 = vsel %vm383_vm1, %v1832_v3, 0.0 }
 0x177   :  { %v1836_v14 = vpop.eup %1835  ;;  %v478_v16 = vsel %vm383_vm1, %v2136_v5, 0.0 }
 0x178   :  { %v1838_v19 = vpop.eup %1837  ;;  %v472_v20 = vadd.f32 %v471_v15, %v470_v6  ;;  %v479_v21 = vadd.f32 %v478_v16, %v477_v9  ;;  %v480_v23 = vsel %vm383_vm1, %v1836_v14, 0.0 }
 0x179   :  { %v1840_v24 = vpop.eup %1839  ;;  %v482_v28 = vsel %vm383_vm1, %v1838_v19, 0.0 }
 0x17a   :  { %v474_v25 = vadd.f32 %v473_v22, %v472_v20  ;;  %v481_v26 = vadd.f32 %v480_v23, %v479_v21  ;;  %v1842_v32 = vpop.eup %1841  ;;  %v484_v35 = vsel %vm383_vm1, %v1840_v24, 0.0 }
 0x17b   :  { %v1844_v36 = vpop.eup %1843  ;;  %v486_v38 = vsel %vm383_vm1, %v1842_v32, 0.0 }
 0x17c   :  { %v476_v33 = vadd.f32 %v475_v27, %v474_v25  ;;  %v483_v34 = vadd.f32 %v482_v28, %v481_v26  ;;  %v1846_v39 = vpop.eup %1845  ;;  %v488_v12 = vsel %vm383_vm1, %v1844_v36, 0.0  ;;  %v974_v25 = vld [vmem:[%s2415_s4 + $0x30] sm:$0xff]  ;;  %v973_v26 = vld [vmem:[%s2415_s4 + $0x28] sm:$0xff]  ;;  %v972_v27 = vld [vmem:[%s2415_s4 + $0x20] sm:$0xff] }
 0x17d   :  { %v490_v40 = vsel %vm383_vm1, %v1846_v39, 0.0  ;;  %vm565_vm1 = vcmask 64512   ;;  %v971_v28 = vld [vmem:[%s2415_s4 + $0x18] sm:$0xff] }
 0x17e   :  { %1847 = vrcp.f32 %v476_v33  ;;  %v485_v37 = vadd.f32 %v484_v35, %v483_v34  ;;  %v968_v34 = vld [vmem:[%s2415_s4] sm:$0xff] }
 0x180   :  { %v487_v10 = vadd.f32 %v486_v38, %v485_v37 }
 0x182   :  { %v489_v30 = vadd.f32 %v488_v12, %v487_v10 }
 0x184   :  { %v491_v17 = vadd.f32 %v490_v40, %v489_v30 }
 0x186   :  { %1849 = vrcp.f32 %v491_v17 }
 0x18b   :  { %v1848_v43 = vpop.eup %1847 }
 0x18c   :  { %v494_v44 = vmul.f32 %v1848_v43, %v476_v33  ;;  %v969_v33 = vld [vmem:[%s2415_s4 + $0x8] sm:$0xff] }
 0x18e   :  { %v496_v18 = vsub.f32 2.0, %v494_v44 }
 0x190   :  { %v498_v45 = vmul.f32 %v1848_v43, %v496_v18 }
 0x192   :  { %v502_v46 = vmul.f32 %v1820_v55, %v498_v45  ;;  %v500_v47 = vmul.f32 %v1816_v51, %v498_v45  ;;  %v504_v49 = vmul.f32 %v1824_v59, %v498_v45  ;;  %v501_v42 = vmul.f32 %v2121_v53, %v498_v45 }
 0x193   :  { %v1850_v41 = vpop.eup %1849  ;;  %v506_v54 = vmul.f32 %v1828_v63, %v498_v45  ;;  %v503_v50 = vmul.f32 %v2126_v57, %v498_v45  ;;  %v505_v56 = vmul.f32 %v2129_v61, %v498_v45  ;;  %v507_v58 = vmul.f32 %v2133_v1, %v498_v45 }
 0x194   :  { %537 = vrot.lane.b32.xlu0 %v502_v46, %s1919_s17  ;;  %533 = vrot.lane.b32.xlu1 %v500_v47, %s1919_s17  ;;  %v495_v48 = vmul.f32 %v1850_v41, %v491_v17 }
 0x196   :  { %v497_v52 = vsub.f32 2.0, %v495_v48 }
 0x198   :  { %541 = vrot.lane.b32.xlu0 %v504_v49, %s1919_s17  ;;  %535 = vrot.lane.b32.xlu1 %v501_v42, %s1919_s17  ;;  %v499_v55 = vmul.f32 %v1850_v41, %v497_v52 }
 0x19a   :  { %v508_v51 = vmul.f32 %v1832_v3, %v499_v55  ;;  %v510_v53 = vmul.f32 %v1836_v14, %v499_v55  ;;  %v512_v57 = vmul.f32 %v1840_v24, %v499_v55  ;;  %v509_v59 = vmul.f32 %v2136_v5, %v499_v55  ;;  %v975_v24 = vld [vmem:[%s2415_s4 + $0x38] sm:$0xff] }
 0x19b   :  { %v514_v60 = vmul.f32 %v1844_v36, %v499_v55  ;;  %v511_v61 = vmul.f32 %v1838_v19, %v499_v55  ;;  %v513_v62 = vmul.f32 %v1842_v32, %v499_v55  ;;  %v515_v63 = vmul.f32 %v1846_v39, %v499_v55  ;;  %1753 = vmatprep.subr.mxu0 %v975_v24  ;;  %v970_v32 = vld [vmem:[%s2415_s4 + $0x10] sm:$0xff] }
 0x19c   :  { %545 = vrot.lane.b32.xlu0 %v506_v54, %s1919_s17  ;;  %539 = vrot.lane.b32.xlu1 %v503_v50, %s1919_s17 }
 0x19d   :  { %1754 = vmatpush3.msra.mxu0 %v975_v24 }
 0x19e   :  { %1755 = vmatprep.subr.mxu0 %v974_v25 }
 0x19f   :  { %1756 = vmatpush3.msra.mxu0 %v974_v25 }
 0x1a0   :  { %549 = vrot.lane.b32.xlu0 %v508_v51, %s1919_s17  ;;  %543 = vrot.lane.b32.xlu1 %v505_v56, %s1919_s17 }
 0x1a1   :  { %1757 = vmatprep.subr.mxu0 %v973_v26 }
 0x1a2   :  { %1758 = vmatpush3.msra.mxu0 %v973_v26 }
 0x1a3   :  { %1759 = vmatprep.subr.mxu0 %v972_v27 }
 0x1a4   :  { %553 = vrot.lane.b32.xlu0 %v510_v53, %s1919_s17  ;;  %547 = vrot.lane.b32.xlu1 %v507_v58, %s1919_s17 }
 0x1a5   :  { %1760 = vmatpush3.msra.mxu0 %v972_v27 }
 0x1a6   :  { %1761 = vmatprep.subr.mxu0 %v971_v28 }
 0x1a7   :  { %1762 = vmatpush3.msra.mxu0 %v971_v28 }
 0x1a8   :  { %557 = vrot.lane.b32.xlu0 %v512_v57, %s1919_s17  ;;  %551 = vrot.lane.b32.xlu1 %v509_v59, %s1919_s17 }
 0x1a9   :  { %1763 = vmatprep.subr.mxu0 %v970_v32 }
 0x1aa   :  { %1764 = vmatpush3.msra.mxu0 %v970_v32 }
 0x1ab   :  { %1765 = vmatprep.subr.mxu0 %v969_v33 }
 0x1ac   :  { %561 = vrot.lane.b32.xlu0 %v514_v60, %s1919_s17  ;;  %555 = vrot.lane.b32.xlu1 %v511_v61, %s1919_s17 }
 0x1ad   :  { %1766 = vmatpush3.msra.mxu0 %v969_v33 }
 0x1ae   :  { %1767 = vmatprep.subr.mxu0 %v968_v34 }
 0x1af   :  { %1768 = vmatpush3.msra.mxu0 %v968_v34 }
 0x1b0   :  { %559 = vrot.lane.b32.xlu1 %v513_v62, %s1919_s17 }
 0x1b4   :  { %563 = vrot.lane.b32.xlu1 %v515_v63, %s1919_s17 }
 0x206   :  { %v538_v0 = vpop.permute.xlu0 %537  ;;  %v534_v1 = vpop.permute.xlu1 %533 }
 0x207   :  { %1729 = vmatprep.mubr.msk.f32.mxu1 %vm565_vm1, %v534_v1 }
 0x20a   :  { %v542_v2 = vpop.permute.xlu0 %541  ;;  %v536_v3 = vpop.permute.xlu1 %535 }
 0x20b   :  { %1730 = vmatmul.mubr.msk.f32.vlgmr.msra.gmra.mxu1 %vm565_vm1, %v536_v3 }
 0x20c   :  { %1732 = vmatprep.mubr.msk.f32.mxu1 %vm565_vm1, %v538_v0 }
 0x20e   :  { %v546_v4 = vpop.permute.xlu0 %545  ;;  %v540_v5 = vpop.permute.xlu1 %539 }
 0x20f   :  { %1733 = vmatmul.mubr.msk.f32.gmra.mxu1 %vm565_vm1, %v540_v5 }
 0x210   :  { %1735 = vmatprep.mubr.msk.f32.mxu1 %vm565_vm1, %v542_v2 }
 0x212   :  { %v550_v6 = vpop.permute.xlu0 %549  ;;  %v544_v9 = vpop.permute.xlu1 %543 }
 0x213   :  { %1736 = vmatmul.mubr.msk.f32.gmra.mxu1 %vm565_vm1, %v544_v9 }
 0x214   :  { %1738 = vmatprep.mubr.msk.f32.mxu1 %vm565_vm1, %v546_v4 }
 0x216   :  { %v548_v14 = vpop.permute.xlu1 %547  ;;  %v554_v15 = vpop.permute.xlu0 %553 }
 0x217   :  { %1739 = vmatmul.mubr.msk.f32.gmra.mxu1 %vm565_vm1, %v548_v14 }
 0x218   :  { %1741 = vmatprep.mubr.msk.f32.mxu1 %vm565_vm1, %v550_v6 }
 0x21a   :  { %v552_v16 = vpop.permute.xlu1 %551  ;;  %v558_v19 = vpop.permute.xlu0 %557 }
 0x21b   :  { %1742 = vmatmul.mubr.msk.f32.gmra.mxu1 %vm565_vm1, %v552_v16 }
 0x21c   :  { %1744 = vmatprep.mubr.msk.f32.mxu1 %vm565_vm1, %v554_v15 }
 0x21e   :  { %v556_v20 = vpop.permute.xlu1 %555  ;;  %v562_v22 = vpop.permute.xlu0 %561 }
 0x21f   :  { %1745 = vmatmul.mubr.msk.f32.gmra.mxu1 %vm565_vm1, %v556_v20 }
 0x220   :  { %1747 = vmatprep.mubr.msk.f32.mxu1 %vm565_vm1, %v558_v19 }
 0x222   :  { %v560_v21 = vpop.permute.xlu1 %559 }
 0x223   :  { %1748 = vmatmul.mubr.msk.f32.gmra.mxu1 %vm565_vm1, %v560_v21 }
 0x224   :  { %1750 = vmatprep.mubr.msk.f32.mxu1 %vm565_vm1, %v562_v22 }
 0x226   :  { %v564_v23 = vpop.permute.xlu1 %563 }
 0x227   :  { %1751 = vmatmul.mubr.msk.f32.gmra.mxu1 %vm565_vm1, %v564_v23 }
 0x2cb   :  { %v1731_v35 = vpop.f32.mrf.mxu1 }
 0x2cc   :  { %v744_v36 = vmul.f32 %v1731_v35, %v2015_v8 }
 0x2cd   :  { %v664_v37 = vpop.f32.mrf.mxu1 }
 0x2ce   :  { %v767_v38 = vsel %vm759_vm4, %v744_v36, 0.0  ;;  %v743_v39 = vmul.f32 %v664_v37, %v2015_v8 }
 0x2cf   :  { %v768_v10 = vrot.slane %v767_v38, 4  ;;  %v1734_v12 = vpop.f32.mrf.mxu1 }
 0x2d0   :  { %v760_v30 = vsel %vm759_vm4, %v743_v39, 0.0  ;;  %v746_v40 = vmul.f32 %v1734_v12, %v2015_v8 }
 0x2d1   :  { %v769_v17 = vadd.f32 %v768_v10, %v767_v38  ;;  %v761_v31 = vrot.slane %v760_v30, 4  ;;  %v674_v43 = vpop.f32.mrf.mxu1 }
 0x2d2   :  { %v781_v44 = vsel %vm759_vm4, %v746_v40, 0.0  ;;  %v745_v18 = vmul.f32 %v674_v43, %v2015_v8 }
 0x2d3   :  { %v770_v45 = vrot.slane %v769_v17, 2  ;;  %v762_v46 = vadd.f32 %v761_v31, %v760_v30  ;;  %v782_v47 = vrot.slane %v781_v44, 4  ;;  %v1737_v41 = vpop.f32.mrf.mxu1 }
 0x2d4   :  { %v774_v48 = vsel %vm759_vm4, %v745_v18, 0.0  ;;  %v748_v49 = vmul.f32 %v1737_v41, %v2015_v8 }
 0x2d5   :  { %v771_v42 = vadd.f32 %v770_v45, %v769_v17  ;;  %v763_v52 = vrot.slane %v762_v46, 2  ;;  %v783_v54 = vadd.f32 %v782_v47, %v781_v44  ;;  %v775_v50 = vrot.slane %v774_v48, 4  ;;  %v684_v55 = vpop.f32.mrf.mxu1 }
 0x2d6   :  { %v795_v51 = vsel %vm759_vm4, %v748_v49, 0.0  ;;  %v747_v56 = vmul.f32 %v684_v55, %v2015_v8 }
 0x2d7   :  { %v772_v53 = vrot.slane %v771_v42, 1  ;;  %v764_v58 = vadd.f32 %v763_v52, %v762_v46  ;;  %v784_v57 = vrot.slane %v783_v54, 2  ;;  %v776_v59 = vadd.f32 %v775_v50, %v774_v48  ;;  %v1740_v60 = vpop.f32.mrf.mxu1 }
 0x2d8   :  { %v796_v61 = vrot.slane %v795_v51, 4  ;;  %v788_v62 = vsel %vm759_vm4, %v747_v56, 0.0  ;;  %v750_v63 = vmul.f32 %v1740_v60, %v2015_v8 }
 0x2d9   :  { %v2229_v0 = vadd.f32 %v772_v53, %v771_v42  ;;  %v765_v1 = vrot.slane %v764_v58, 1  ;;  %v785_v2 = vadd.f32 %v784_v57, %v783_v54  ;;  %v777_v3 = vrot.slane %v776_v59, 2  ;;  %v694_v4 = vpop.f32.mrf.mxu1 }
 0x2da   :  { %v797_v5 = vadd.f32 %v796_v61, %v795_v51  ;;  %v789_v6 = vrot.slane %v788_v62, 4  ;;  %v809_v9 = vsel %vm759_vm4, %v750_v63, 0.0  ;;  %v749_v27 = vmul.f32 %v694_v4, %v2015_v8 }
 0x2db   :  { %v889_v14 = vmin.f32 %v2229_v0, 0.0  ;;  %v2233_v15 = vadd.f32 %v765_v1, %v764_v58  ;;  %v786_v16 = vrot.slane %v785_v2, 1  ;;  %v1743_v19 = vpop.f32.mrf.mxu1  ;;  %v778_v20 = vadd.f32 %v777_v3, %v776_v59 }
 0x2dc   :  { %v798_v21 = vrot.slane %v797_v5, 2  ;;  %v790_v22 = vadd.f32 %v789_v6, %v788_v62  ;;  %v810_v23 = vrot.slane %v809_v9, 4  ;;  %v802_v17 = vsel %vm759_vm4, %v749_v27, 0.0 }
 0x2dd   :  { %v906_v24 = vmul.f32 1.442695, %v889_v14  ;;  %v888_v25 = vmin.f32 %v2233_v15, 0.0  ;;  %v2236_v26 = vadd.f32 %v786_v16, %v785_v2  ;;  %v704_v28 = vpop.f32.mrf.mxu1  ;;  %v779_v32 = vrot.slane %v778_v20, 1 }
 0x2de   :  { %v799_v33 = vadd.f32 %v798_v21, %v797_v5  ;;  %v791_v34 = vrot.slane %v790_v22, 2  ;;  %v811_v35 = vadd.f32 %v810_v23, %v809_v9  ;;  %v752_v8 = vmul.f32 %v1743_v19, %v2013_v7 }
 0x2df   :  { %v904_v36 = vmul.f32 1.442695, %v888_v25  ;;  %v891_v37 = vmin.f32 %v2236_v26, 0.0  ;;  %v1746_v38 = vpop.f32.mrf.mxu1  ;;  %v2240_v39 = vadd.f32 %v779_v32, %v778_v20  ;;  %v803_v45 = vrot.slane %v802_v17, 4 }
 0x2e0   :  { %v800_v10 = vrot.slane %v799_v33, 1  ;;  %v792_v12 = vadd.f32 %v791_v34, %v790_v22  ;;  %v812_v30 = vrot.slane %v811_v35, 2  ;;  %v823_v46 = vsel %vm759_vm4, %v752_v8, 0.0 }
 0x2e1   :  { %1851 = vpow2.f32 %v904_v36  ;;  %v910_v40 = vmul.f32 1.442695, %v891_v37  ;;  %v890_v31 = vmin.f32 %v2240_v39, 0.0  ;;  %v714_v47 = vpop.f32.mrf.mxu1  ;;  %v804_v52 = vadd.f32 %v803_v45, %v802_v17 }
 0x2e2   :  { %1853 = vpow2.f32 %v906_v24  ;;  %v2245_v43 = vadd.f32 %v800_v10, %v799_v33  ;;  %v793_v44 = vrot.slane %v792_v12, 1  ;;  %v813_v18 = vadd.f32 %v812_v30, %v811_v35 }
 0x2e3   :  { %1855 = vpow2.f32 %v910_v40  ;;  %v908_v41 = vmul.f32 1.442695, %v890_v31  ;;  %v824_v54 = vrot.slane %v823_v46, 4  ;;  %v751_v50 = vmul.f32 %v2013_v7, %v704_v28  ;;  %v1749_v57 = vpop.f32.mrf.mxu1 }
 0x2e4   :  { %v893_v48 = vmin.f32 %v2245_v43, 0.0  ;;  %v2249_v49 = vadd.f32 %v793_v44, %v792_v12  ;;  %v814_v42 = vrot.slane %v813_v18, 1  ;;  %v805_v56 = vrot.slane %v804_v52, 2 }
 0x2e5   :  { %1857 = vpow2.f32 %v908_v41  ;;  %v825_v53 = vadd.f32 %v824_v54, %v823_v46  ;;  %v816_v58 = vsel %vm759_vm4, %v751_v50, 0.0  ;;  %v754_v62 = vmul.f32 %v1746_v38, %v2013_v7  ;;  %v724_v34 = vpop.f32.mrf.mxu1 }
 0x2e6   :  { %v892_v55 = vmin.f32 %v2249_v49, 0.0  ;;  %v2253_v51 = vadd.f32 %v814_v42, %v813_v18  ;;  %v914_v59 = vmul.f32 1.442695, %v893_v48  ;;  %v817_v61 = vrot.slane %v816_v58, 4 }
 0x2e7   :  { %v806_v1 = vadd.f32 %v805_v56, %v804_v52  ;;  %v826_v2 = vrot.slane %v825_v53, 2  ;;  %v753_v3 = vmul.f32 %v2013_v7, %v714_v47  ;;  %v837_v5 = vsel %vm759_vm4, %v754_v62, 0.0  ;;  %v1752_v48 = vpop.f32.mrf.mxu1 }
 0x2e8   :  { %v912_v60 = vmul.f32 1.442695, %v892_v55  ;;  %v895_v63 = vmin.f32 %v2253_v51, 0.0  ;;  %v818_v4 = vadd.f32 %v817_v61, %v816_v58  ;;  %v756_v6 = vmul.f32 %v1749_v57, %v2013_v7 }
 0x2e9   :  { %v807_v14 = vrot.slane %v806_v1, 1  ;;  %v827_v16 = vadd.f32 %v826_v2, %v825_v53  ;;  %v838_v19 = vrot.slane %v837_v5, 4  ;;  %v830_v21 = vsel %vm759_vm4, %v753_v3, 0.0 }
 0x2ea   :  { %1859 = vpow2.f32 %v912_v60  ;;  %v918_v9 = vmul.f32 1.442695, %v895_v63  ;;  %v819_v20 = vrot.slane %v818_v4, 2  ;;  %v851_v22 = vsel %vm759_vm4, %v756_v6, 0.0 }
 0x2eb   :  { %1861 = vpow2.f32 %v914_v59  ;;  %v2263_v23 = vadd.f32 %v807_v14, %v806_v1  ;;  %v828_v24 = vrot.slane %v827_v16, 1  ;;  %v839_v28 = vadd.f32 %v838_v19, %v837_v5  ;;  %v734_v1 = vpop.f32.mrf.mxu1 }
 0x2ec   :  { %v820_v27 = vadd.f32 %v819_v20, %v818_v4  ;;  %v831_v32 = vrot.slane %v830_v21, 4  ;;  %v852_v33 = vrot.slane %v851_v22, 4  ;;  %1863 = vpow2.f32 %v918_v9 }
 0x2ed   :  { %v894_v37 = vmin.f32 %v2263_v23, 0.0  ;;  %v2266_v38 = vadd.f32 %v828_v24, %v827_v16  ;;  %v840_v12 = vrot.slane %v839_v28, 2  ;;  %vm873_vm5 = vcmp.gt.f32.partialorder %v2229_v0, 0.0 }
 0x2ee   :  { %v1852_v25 = vpop.eup %1851  ;;  %v821_v10 = vrot.slane %v820_v27, 1  ;;  %v832_v30 = vadd.f32 %v831_v32, %v830_v21  ;;  %v853_v40 = vadd.f32 %v852_v33, %v851_v22  ;;  %v755_v31 = vmul.f32 %v2013_v7, %v724_v34 }
 0x2ef   :  { %v1854_v35 = vpop.eup %1853  ;;  %v1642_v36 = vadd.f32 -1.0, %v1852_v25  ;;  %v916_v8 = vmul.f32 1.442695, %v894_v37  ;;  %vm872_vm7 = vcmp.gt.f32.partialorder %v2233_v15, 0.0  ;;  %v841_v45 = vadd.f32 %v840_v12, %v839_v28 }
 0x2f0   :  { %v1856_v17 = vpop.eup %1855  ;;  %v1643_v44 = vadd.f32 -1.0, %v1854_v35  ;;  %v2271_v18 = vadd.f32 %v821_v10, %v820_v27  ;;  %vm875_vm8 = vcmp.gt.f32.partialorder %v2236_v26, 0.0  ;;  %v833_v47 = vrot.slane %v832_v30, 2 }
 0x2f1   :  { %1865 = vpow2.f32 %v916_v8  ;;  %v854_v41 = vrot.slane %v853_v40, 2  ;;  %v952_v42 = vsel %vm872_vm7, %v2233_v15, %v1642_v36  ;;  %vm874_vm10 = vcmp.gt.f32.partialorder %v2240_v39, 0.0 }
 0x2f2   :  { %v1858_v46 = vpop.eup %1857  ;;  %v897_v52 = vmin.f32 %v2266_v38, 0.0  ;;  %v896_v54 = vmin.f32 %v2271_v18, 0.0  ;;  %v842_v50 = vrot.slane %v841_v45, 1  ;;  %v834_v55 = vadd.f32 %v833_v47, %v832_v30 }
 0x2f3   :  { %v855_v56 = vadd.f32 %v854_v41, %v853_v40  ;;  %v844_v53 = vsel %vm759_vm4, %v755_v31, 0.0  ;;  %v953_v58 = vsel %vm873_vm5, %v2229_v0, %v1643_v44  ;;  %v1645_v57 = vadd.f32 -1.0, %v1856_v17 }
 0x2f4   :  { %vm876_vm11 = vcmp.gt.f32.partialorder %v2249_v49, 0.0  ;;  %v845_v59 = vrot.slane %v844_v53, 4  ;;  %v1644_v60 = vadd.f32 -1.0, %v1858_v46  ;;  %v2283_v61 = vadd.f32 %v842_v50, %v841_v45 }
 0x2f5   :  { %v835_v62 = vrot.slane %v834_v55, 1  ;;  %v856_v63 = vrot.slane %v855_v56, 1  ;;  %v993_v2 = vsel %vm992_vm6, %v953_v58, %v952_v42  ;;  %v922_v3 = vmul.f32 1.442695, %v897_v52 }
 0x2f6   :  { %v846_v4 = vadd.f32 %v845_v59, %v844_v53  ;;  %v758_v5 = vmul.f32 %v1752_v48, %v2013_v7  ;;  %vm877_vm15 = vcmp.gt.f32.partialorder %v2245_v43, 0.0  ;;  %v920_v0 = vmul.f32 1.442695, %v896_v54 }
 0x2f7   :  { %v1860_v15 = vpop.eup %1859  ;;  %v899_v6 = vmin.f32 %v2283_v61, 0.0  ;;  %v2289_v9 = vadd.f32 %v835_v62, %v834_v55  ;;  %v2291_v14 = vadd.f32 %v856_v63, %v855_v56  ;;  %v955_v19 = vsel %vm875_vm8, %v2236_v26, %v1645_v57 }
 0x2f8   :  { %v1862_v16 = vpop.eup %1861  ;;  %v847_v20 = vrot.slane %v846_v4, 2  ;;  %v865_v21 = vsel %vm759_vm4, %v758_v5, 0.0  ;;  %v757_v22 = vmul.f32 %v2013_v7, %v734_v1  ;;  %v954_v24 = vsel %vm874_vm10, %v2240_v39, %v1644_v60 }
 0x2f9   :  { %v1646_v25 = vadd.f32 -1.0, %v1860_v15  ;;  %v926_v27 = vmul.f32 1.442695, %v899_v6  ;;  %v898_v28 = vmin.f32 %v2289_v9, 0.0  ;;  %v1864_v32 = vpop.eup %1863  ;;  %1867 = vpow2.f32 %v922_v3 }
 0x2fa   :  { %v848_v33 = vadd.f32 %v847_v20, %v846_v4  ;;  %v866_v34 = vrot.slane %v865_v21, 4  ;;  %v858_v26 = vsel %vm759_vm4, %v757_v22, 0.0  ;;  %1869 = vpow2.f32 %v920_v0 }
 0x2fb   :  { %v924_v35 = vmul.f32 1.442695, %v898_v28  ;;  %v901_v36 = vmin.f32 %v2291_v14, 0.0  ;;  %v859_v7 = vrot.slane %v858_v26, 4  ;;  %v995_v37 = vsel %vm994_vm9, %v954_v24, %v993_v2 }
 0x2fc   :  { %1871 = vpow2.f32 %v926_v27  ;;  %v849_v10 = vrot.slane %v848_v33, 1  ;;  %v867_v39 = vadd.f32 %v866_v34, %v865_v21  ;;  %v956_v12 = vsel %vm876_vm11, %v2249_v49, %v1646_v25 }
 0x2fd   :  { %1873 = vpow2.f32 %v924_v35  ;;  %v860_v30 = vadd.f32 %v859_v7, %v858_v26  ;;  %v1647_v40 = vadd.f32 -1.0, %v1862_v16  ;;  %vm878_vm5 = vcmp.gt.f32.partialorder %v2263_v23, 0.0 }
 0x2fe   :  { %v1866_v17 = vpop.eup %1865  ;;  %v850_v8 = vadd.f32 %v849_v10, %v848_v33  ;;  %v868_v31 = vrot.slane %v867_v39, 2  ;;  %v1649_v44 = vadd.f32 -1.0, %v1864_v32  ;;  %v930_v45 = vmul.f32 1.442695, %v901_v36 }
 0x2ff   :  { %v861_v46 = vrot.slane %v860_v30, 2  ;;  %v1648_v47 = vadd.f32 -1.0, %v1866_v17  ;;  %v997_v41 = vsel %vm996_vm12, %v955_v19, %v995_v37  ;;  %v957_v49 = vsel %vm877_vm15, %v2245_v43, %v1647_v40 }
 0x300   :  { %v900_v48 = vmin.f32 %v850_v8, 0.0  ;;  %v869_v42 = vadd.f32 %v868_v31, %v867_v39  ;;  %v999_v52 = vsel %vm998_vm13, %v956_v12, %v997_v41  ;;  %vm879_vm7 = vcmp.gt.f32.partialorder %v2253_v51, 0.0 }
 0x301   :  { %v862_v54 = vadd.f32 %v861_v46, %v860_v30  ;;  %v958_v50 = vsel %vm878_vm5, %v2263_v23, %v1648_v47  ;;  %v1001_v55 = vsel %vm1000_vm14, %v957_v49, %v999_v52  ;;  %v959_v58 = vsel %vm879_vm7, %v2253_v51, %v1649_v44  ;;  %v1358_v47 = vld [vmem:[%s2418_s7] sm:$0xff] }
 0x302   :  { %v928_v56 = vmul.f32 1.442695, %v900_v48  ;;  %v870_v53 = vrot.slane %v869_v42, 1  ;;  %v1003_v57 = vsel %vm1002_vm2, %v958_v50, %v1001_v55  ;;  %vm880_vm8 = vcmp.gt.f32.partialorder %v2271_v18, 0.0 }
 0x303   :  { %v863_v59 = vrot.slane %v862_v54, 1  ;;  %v1005_v15 = vsel %vm1004_vm3, %v959_v58, %v1003_v57  ;;  %vm882_vm10 = vcmp.gt.f32.partialorder %v2289_v9, 0.0  ;;  %vm881_vm11 = vcmp.gt.f32.partialorder %v2266_v38, 0.0 }
 0x304   :  { %1875 = vpow2.f32 %v928_v56  ;;  %v871_v43 = vadd.f32 %v870_v53, %v869_v42  ;;  %1769 = vmatprep.mubr.msk.f32.mxu0 %vm759_vm4, %v1005_v15  ;;  %vm884_vm15 = vcmp.gt.f32.partialorder %v850_v8, 0.0  ;;  %vm883_vm5 = vcmp.gt.f32.partialorder %v2283_v61, 0.0 }
 0x305   :  { %v864_v60 = vadd.f32 %v863_v59, %v862_v54  ;;  %1877 = vpow2.f32 %v930_v45  ;;  %vm885_vm7 = vcmp.gt.f32.partialorder %v2291_v14, 0.0  ;;  %v1920_v30 = vmov 0.0  }
 0x306   :  { %v903_v62 = vmin.f32 %v871_v43, 0.0  ;;  %v1868_v63 = vpop.eup %1867  ;;  %1772 = vmatprep.subr.mxu0 %v1920_v30  ;;  %1782 = vmatprep.subr.mxu1 %v1920_v30  ;;  %v1921_v40 = vmov 8   ;;  %v1120_v41 = vand.u32 127, %v139_v11 }
 0x307   :  { %v902_v23 = vmin.f32 %v864_v60, 0.0  ;;  %v1870_v1 = vpop.eup %1869  ;;  %v1651_v6 = vadd.f32 -1.0, %v1868_v63  ;;  %1812 = vset.pattern.permute.xlu1 %v1921_v40  ;;  %1811 = vset.pattern.permute.xlu0 %v1921_v40 }
 0x308   :  { %v934_v2 = vmul.f32 1.442695, %v903_v62  ;;  %v1650_v51 = vadd.f32 -1.0, %v1870_v1  ;;  %1783 = vmatpush3.msra.mxu1 %v1358_v47  ;;  %v1123_v48 = vsub.s32 %v1120_v41, %v2020_v13  ;;  %v1354_v47 = vld [vmem:[%s2417_s6] sm:$0xff] }
 0x309   :  { %v1872_v3 = vpop.eup %1871  ;;  %v932_v4 = vmul.f32 1.442695, %v902_v23  ;;  %v961_v21 = vsel %vm881_vm11, %v2266_v38, %v1651_v6  ;;  %1798 = vmatprep.subr.mxu1 %v1920_v30  ;;  %v1353_v41 = vld [vmem:[%s2411_s0] sm:$0x3] }
 0x30a   :  { %v1874_v5 = vpop.eup %1873  ;;  %1879 = vpow2.f32 %v934_v2  ;;  %v960_v16 = vsel %vm880_vm8, %v2271_v18, %v1650_v51  ;;  %v1653_v22 = vadd.f32 -1.0, %v1872_v3  ;;  %vm887_vm8 = vcmp.gt.f32.partialorder %v871_v43, 0.0 }
 0x30b   :  { %1881 = vpow2.f32 %v932_v4  ;;  %v1652_v0 = vadd.f32 -1.0, %v1874_v5  ;;  %v1006_v27 = vsel %vm992_vm6, %v961_v21, %v960_v16 }
 0x30c   :  { %v963_v32 = vsel %vm883_vm5, %v2283_v61, %v1653_v22 }
 0x30d   :  { %v962_v20 = vsel %vm882_vm10, %v2289_v9, %v1652_v0 }
 0x30e   :  { %v1007_v28 = vsel %vm994_vm9, %v962_v20, %v1006_v27  ;;  %vm886_vm9 = vcmp.gt.f32.partialorder %v864_v60, 0.0 }
 0x30f   :  { %v1008_v26 = vsel %vm996_vm12, %v963_v32, %v1007_v28 }
 0x311   :  { %v1876_v19 = vpop.eup %1875 }
 0x312   :  { %v1654_v24 = vadd.f32 -1.0, %v1876_v19  ;;  %v1878_v25 = vpop.eup %1877 }
 0x313   :  { %v1655_v33 = vadd.f32 -1.0, %v1878_v25 }
 0x314   :  { %v964_v18 = vsel %vm884_vm15, %v850_v8, %v1654_v24 }
 0x315   :  { %v1009_v38 = vsel %vm998_vm13, %v964_v18, %v1008_v26  ;;  %v965_v7 = vsel %vm885_vm7, %v2291_v14, %v1655_v33  ;;  %v1660_v14 = vld [vmem:[%s2416_s5] ss:$0 sm:$0xff] }
 0x316   :  { %v1010_v10 = vsel %vm1000_vm14, %v965_v7, %v1009_v38 }
 0x317   :  { %v1880_v34 = vpop.eup %1879 }
 0x318   :  { %v1882_v9 = vpop.eup %1881  ;;  %v1657_v35 = vadd.f32 -1.0, %v1880_v34 }
 0x319   :  { %v1656_v36 = vadd.f32 -1.0, %v1882_v9 }
 0x31a   :  { %v967_v39 = vsel %vm887_vm8, %v871_v43, %v1657_v35 }
 0x31b   :  { %v966_v37 = vsel %vm886_vm9, %v864_v60, %v1656_v36 }
 0x31c   :  { %v1011_v61 = vsel %vm1002_vm2, %v966_v37, %v1010_v10 }
 0x31d   :  { %v1012_v12 = vsel %vm1004_vm3, %v967_v39, %v1011_v61 }
 0x31e   :  { %1770 = vmatmul.mubr.msk.f32.vlgmr.msra.gmra.mxu0 %vm759_vm4, %v1012_v12  ;;  %vm1922_vm4 = vmmov 0  }
 0x31f   :  { %1774 = vmatprep.mubr.msk.f32.mxu0 %vm1922_vm4, %v1920_v30  ;;  %1784 = vmatprep.mubr.msk.f32.mxu1 %vm1922_vm4, %v1920_v30 }
 0x3de   :  { %v2344_v17 = vpop.f32.mrf.mxu0 }
 0x3df   :  { %v1100_v8 = vmul.f32 %v2344_v17, %v1660_v14 }
 0x3e0   :  { %v1083_v31 = vpop.f32.mrf.mxu0 }
 0x3e1   :  { %1773 = vmatpush3.msra.mxu0 %v1083_v31  ;;  %v1104_v44 = vsel %vm565_vm1, %v1100_v8, 0.0  ;;  %v1099_v45 = vmul.f32 %v1660_v14, %v1083_v31 }
 0x3e2   :  { %1105 = vadd.xlane.f32.xlu1 %v1104_v44  ;;  %1777 = vmatprep.subr.mxu0 %v1920_v30 }
 0x3e3   :  { %v1101_v46 = vsel %vm565_vm1, %v1099_v45, 0.0  ;;  %v1357_v45 = vld [vmem:[%s2417_s6 + $0x18] sm:$0xff] }
 0x3e4   :  { %1102 = vadd.xlane.f32.xlu0 %v1101_v46  ;;  %v1355_v46 = vld [vmem:[%s2417_s6 + $0x8] sm:$0xff] }
 0x3f3   :  { %1114 = vperm.xlu1 %1812, %v2344_v17  }
 0x3fa   :  { %1109 = vperm.xlu0 %1811, %v1083_v31  }
 0x46b   :  { %v1106_v42 = vpop.xlane.xlu1 %1105 }
 0x46c   :  { %v1128_v49 = vrot.slane %v1106_v42, %v1123_v48 }
 0x46d   :  { %v1103_v50 = vpop.xlane.xlu0 %1102 }
 0x46e   :  { %v1124_v56 = vrot.slane %v1103_v50, %v1123_v48 }
 0x46f   :  { %v1115_v52 = vpop.permute.xlu1 %1114 }
 0x470   :  { %v1144_v54 = vadd.f32 %v1128_v49, %v1115_v52 }
 0x472   :  { %vm1146_vm12 = vcmp.ge.f32.partialorder %v1144_v54, 0.0  ;;  %v1148_v55 = vmul.f32 0.2, %v1144_v54 }
 0x474   :  { %v1150_v53 = vsel %vm1146_vm12, %v1144_v54, %v1148_v55 }
 0x475   :  { %v1158_v58 = vsel %vm565_vm1, %v1150_v53, -inf  ;;  %v1110_v57 = vpop.permute.xlu0 %1109 }
 0x476   :  { %v1159_v59 = vrot.slane %v1158_v58, 4  ;;  %v1143_v15 = vadd.f32 %v1124_v56, %v1110_v57 }
 0x478   :  { %v1160_v43 = vmax.f32 %v1158_v58, %v1159_v59  ;;  %vm1145_vm13 = vcmp.ge.f32.partialorder %v1143_v15, 0.0  ;;  %v1147_v60 = vmul.f32 0.2, %v1143_v15 }
 0x47a   :  { %v1161_v11 = vrot.slane %v1160_v43, 2  ;;  %v1149_v62 = vsel %vm1145_vm13, %v1143_v15, %v1147_v60 }
 0x47b   :  { %v1151_v13 = vsel %vm565_vm1, %v1149_v62, -inf }
 0x47c   :  { %v1162_v63 = vmax.f32 %v1160_v43, %v1161_v11  ;;  %v1152_v23 = vrot.slane %v1151_v13, 4 }
 0x47e   :  { %v1163_v1 = vrot.slane %v1162_v63, 1  ;;  %v1153_v2 = vmax.f32 %v1151_v13, %v1152_v23  ;;  %v1923_v23 = vmov 0  }
 0x47f   :  { %1813 = vset.pattern.permute.xlu1 %v1923_v23  ;;  %1814 = vset.pattern.permute.xlu0 %v1923_v23 }
 0x480   :  { %v1164_v3 = vmax.f32 %v1162_v63, %v1163_v1  ;;  %v1154_v4 = vrot.slane %v1153_v2, 2  ;;  %v1522_v63 = vld [vmem:[#allocation2] sm:$0x1] }
 0x481   :  { %1525 = vperm.xlu1 %1813, %v1522_v63  }
 0x482   :  { %v1166_v5 = vsub.f32 %v1150_v53, %v1164_v3  ;;  %v1155_v51 = vmax.f32 %v1153_v2, %v1154_v4  ;;  %v1667_v2 = vld [vmem:[%s2419_s8] ss:$0 sm:$0xff]  ;;  %v1518_v4 = vstv %s2422_s11  ;;  %s1924_s8 = smov [#allocation4]  }
 0x483   :  { %s1616_s26 = sshll.u32 %s1924_s8, 4  ;;  %s1617_s26 = int_to_ptr.vmem [resolvable:$true] %s1616_s26 }
 0x484   :  { %v1169_v0 = vmul.f32 1.442695, %v1166_v5  ;;  %v1156_v6 = vrot.slane %v1155_v51, 1  ;;  %s1895_s11 = scalar_lea.vmem %s1617_s26, 16  ;;  %s1899_s27 = scalar_lea.vmem %s1617_s26, 32 }
 0x485   :  { %p1896_p0 = scmp.ne.s32.totalorder %s1617_s26, %s1895_s11  ;;  %p1900_p1 = scmp.lt.s32.totalorder %s1617_s26, %s1617_s26 }
 0x486   :  { %1883 = vpow2.f32 %v1169_v0  ;;  %v1157_v16 = vmax.f32 %v1155_v51, %v1156_v6  ;;  %v1521_v6 = vld [vmem:[%s2420_s9] sm:$0x1]  ;;  %p1901_p2 = scmp.lt.s32.totalorder %s1899_s27, %s1895_s11 }
 0x488   :  { %v1165_v19 = vsub.f32 %v1149_v62, %v1157_v16  ;;  %p1902_p3 = por %p1901_p2, %p1900_p1 }
 0x48a   :  { %v1167_v20 = vmul.f32 1.442695, %v1165_v19  ;;  %p1903_p4 = pnand %p1902_p3, %p1896_p0 }
 0x48c   :  { %1885 = vpow2.f32 %v1167_v20 }
 0x493   :  { %v1884_v21 = vpop.eup %1883 }
 0x494   :  { %v1178_v22 = vsel %vm565_vm1, %v1884_v21, 0.0 }
 0x495   :  { %v1179_v24 = vrot.slane %v1178_v22, 4 }
 0x497   :  { %v1180_v25 = vadd.f32 %v1179_v24, %v1178_v22 }
 0x499   :  { %v1886_v27 = vpop.eup %1885  ;;  %v1181_v28 = vrot.slane %v1180_v25, 2 }
 0x49a   :  { %v1171_v18 = vsel %vm565_vm1, %v1886_v27, 0.0 }
 0x49b   :  { %v1172_v32 = vrot.slane %v1171_v18, 4  ;;  %v1182_v33 = vadd.f32 %v1181_v28, %v1180_v25 }
 0x49d   :  { %v1173_v34 = vadd.f32 %v1172_v32, %v1171_v18  ;;  %v1183_v26 = vrot.slane %v1182_v33, 1 }
 0x49f   :  { %v1174_v9 = vrot.slane %v1173_v34, 2  ;;  %v1184_v35 = vadd.f32 %v1183_v26, %v1182_v33 }
 0x4a1   :  { %v1175_v38 = vadd.f32 %v1174_v9, %v1173_v34  ;;  %1887 = vrcp.f32 %v1184_v35 }
 0x4a3   :  { %v1176_v36 = vrot.slane %v1175_v38, 1 }
 0x4a5   :  { %v1177_v7 = vadd.f32 %v1176_v36, %v1175_v38 }
 0x4a7   :  { %1889 = vrcp.f32 %v1177_v7 }
 0x4ae   :  { %v1888_v37 = vpop.eup %1887 }
 0x4af   :  { %v1188_v10 = vmul.f32 %v1888_v37, %v1184_v35 }
 0x4b1   :  { %v1190_v40 = vsub.f32 2.0, %v1188_v10 }
 0x4b3   :  { %v1192_v31 = vmul.f32 %v1888_v37, %v1190_v40 }
 0x4b4   :  { %v1890_v39 = vpop.eup %1889 }
 0x4b5   :  { %v1187_v61 = vmul.f32 %v1890_v39, %v1177_v7  ;;  %v1194_v44 = vmul.f32 %v1884_v21, %v1192_v31 }
 0x4b7   :  { %v1189_v12 = vsub.f32 2.0, %v1187_v61 }
 0x4b9   :  { %v1191_v14 = vmul.f32 %v1890_v39, %v1189_v12 }
 0x4bb   :  { %v1193_v8 = vmul.f32 %v1886_v27, %v1191_v14 }
 0x4bd   :  { %1775 = vmatmul.mubr.msk.f32.vlgmr.msra.gmra.mxu0 %vm565_vm1, %v1193_v8 }
 0x4be   :  { %1778 = vmatpush3.msra.mxu0 %v2344_v17  ;;  %1779 = vmatprep.mubr.msk.f32.mxu0 %vm1922_vm4, %v1920_v30  ;;  %v1356_v17 = vld [vmem:[%s2417_s6 + $0x10] sm:$0xff] }
 0x4bf   :  { %1787 = vmatprep.subr.mxu0 %v1920_v30 }
 0x4c1   :  { %1780 = vmatmul.mubr.msk.f32.vlgmr.msra.gmra.mxu0 %vm565_vm1, %v1194_v44 }
 0x4c2   :  { %1795 = vmatprep.mubr.msk.f32.mxu0 %vm1922_vm4, %v1920_v30  ;;  %1788 = vmatpush3.msra.mxu0 %v1357_v45 }
 0x4c3   :  { %1789 = vmatprep.subr.mxu0 %v1920_v30 }
 0x4c4   :  { %1790 = vmatpush3.msra.mxu0 %v1356_v17 }
 0x4c5   :  { %1791 = vmatprep.subr.mxu0 %v1920_v30 }
 0x4c6   :  { %1792 = vmatpush3.msra.mxu0 %v1355_v46 }
 0x4c7   :  { %1793 = vmatprep.subr.mxu0 %v1920_v30 }
 0x4c8   :  { %1794 = vmatpush3.msra.mxu0 %v1354_v47 }
 0x4c9   :  { %1796 = vmatmul.mubr.msk.f32.vlgmr.msra.gmra.mxu0 %vm51_vm0, %v1353_v41 }
 0x4fc   :  { %v1526_v16 = vpop.permute.xlu1 %1525 }
 0x4fd   :  { %v1531_v19 = vrot.slane %v1526_v16, %v2030_v29 }
 0x57d   :  { %v1264_v48 = vpop.f32.mrf.mxu0 }
 0x57e   :  { %v1343_v42 = vmin.f32 %v1264_v48, 0.0  ;;  %vm1341_vm2 = vcmp.gt.f32.partialorder %v1264_v48, 0.0 }
 0x57f   :  { %v1776_v49 = vpop.f32.mrf.mxu0 }
 0x580   :  { %v1345_v52 = vmul.f32 1.442695, %v1343_v42 }
 0x581   :  { %v1337_v54 = vpop.f32.mrf.mxu0 }
 0x582   :  { %v1344_v50 = vmin.f32 %v1337_v54, 0.0  ;;  %1891 = vpow2.f32 %v1345_v52  ;;  %vm1342_vm14 = vcmp.gt.f32.partialorder %v1337_v54, 0.0 }
 0x583   :  { %v1781_v55 = vpop.f32.mrf.mxu0 }
 0x584   :  { %v1347_v56 = vmul.f32 1.442695, %v1344_v50 }
 0x586   :  { %1893 = vpow2.f32 %v1347_v56 }
 0x589   :  { %v1504_v62 = vpop.f32.mrf.mxu0 }
 0x58b   :  { %v1797_v13 = vpop.f32.mrf.mxu0 }
 0x58f   :  { %v1892_v53 = vpop.eup %1891 }
 0x590   :  { %v1663_v57 = vadd.f32 -1.0, %v1892_v53 }
 0x592   :  { %v1351_v60 = vsel %vm1341_vm2, %v1264_v48, %v1663_v57 }
 0x593   :  { %v1894_v58 = vpop.eup %1893 }
 0x594   :  { %v1664_v59 = vadd.f32 -1.0, %v1894_v58 }
 0x596   :  { %v1352_v15 = vsel %vm1342_vm14, %v1337_v54, %v1664_v59 }
 0x597   :  { %v1361_v43 = vrot.slane %v1352_v15, 7 }
 0x599   :  { %v1362_v11 = vsel %vm992_vm6, %v1361_v43, %v1351_v60  ;;  %vm1608_vm6 = vcmask 8192  }
 0x59a   :  { %1785 = vmatmul.mubr.msk.f32.vlgmr.msra.gmra.mxu1 %vm565_vm1, %v1362_v11 }
 0x59b   :  { %1800 = vmatprep.mubr.msk.f32.mxu1 %vm1922_vm4, %v1920_v30 }
 0x65a   :  { %v1431_v1 = vpop.f32.mrf.mxu1 }
 0x65b   :  { %v1505_v3 = vadd.f32 %v1504_v62, %v1431_v1 }
 0x65c   :  { %v1786_v5 = vpop.f32.mrf.mxu1 }
 0x65d   :  { %v1515_v51 = vadd.f32 %v1667_v2, %v1505_v3 }
 0x65f   :  { %vm1517_vm0 = vcmp.ge.f32.partialorder %v1515_v51, 0.0  ;;  %v1519_v30 = vmul.f32 %v1518_v4, %v1515_v51 }
 0x661   :  { %v1520_v0 = vsel %vm1517_vm0, %v1515_v51, %v1519_v30 }
 0x662   :  { %1799 = vmatpush3.xpose.msk.msra.mxu1 %vm565_vm1, %v1520_v0 }
 0x665   :  { %1801 = vmatmul.mubr.msk.f32.vlgmr.msra.gmra.mxu1 %vm565_vm1, %v1521_v6 }
 0x725   :  { %v1604_v20 = vpop.f32.mrf.mxu1 }
 0x726   :  { %v1605_v21 = vadd.f32 %v1604_v20, %v1531_v19 }
 0x727   :  { %v1802_v22 = vpop.f32.mrf.mxu1 }
 0x728   :  { %1609 = vst.msk [vmem:[#allocation4] sm:$0x1] %vm1608_vm6, %v1605_v21 }
 0x729   :  { %1906 = shalt.err (!%p1903_p4)
}
 0x72a   :  { %1619 = dma.vmem_to_hbm [thread:$0]  %s1617_s26, 16, %s2423_s12, [#allocation5]  }
 0x72b   :  { %1915 = dma.done.wait [#allocation5], 16  }
 0x72c   :  { %1916 = vsyncadd [#allocation5], 4294967280 }
 0x72d   :  { %1623 = vsyncpa [#allocation5], 1 }

</bundles_post_ra>
